<compile_context>
chip_gen: v7x
topology: tpu7x:2x2x1
jax: 0.10.0
libtpu: 0.0.40
codegen_flags: <defaults>
</compile_context>

<pallas_src>
import jax
import jax.numpy as jnp
from jax.experimental import pallas as pl
from jax.experimental.pallas import tpu as pltpu


# ---------------------------------------------------------------------------
# Single fused kernel: bidirectional LSTM recurrence + projection head.
# ---------------------------------------------------------------------------
def encoder_kernel(x_ref, w_lstm_ref, b_lstm_ref, w_head_ref, b_head_ref,
                   eps_ref, out_ref):
    """Fused encoder forward.

    x_ref      : (T, B, D)       full sequence, time-major
    w_lstm_ref : (2D+2H, 8H)     block-diag fused [wih_f;whh_f | wih_b;whh_b]
    b_lstm_ref : (1, 8H)         [b_f | b_b]  (each = b_ih + b_hh)
    w_head_ref : (2H, 2L)        [wmu | wstd]
    b_head_ref : (1, 2L)         [bmu | bstd]
    eps_ref    : (B, L)          reparameterization noise
    out_ref    : (B, 3L)         packed [z | mu | std]
    """
    T, B, D = x_ref.shape
    H = b_lstm_ref.shape[-1] // 8
    L = b_head_ref.shape[-1] // 2

    w_lstm = w_lstm_ref[...]
    b_lstm = b_lstm_ref[...]

    def lstm_cell(gates, c):
        # PyTorch gate order along the 4H axis: [i, f, g, o]
        i = jax.nn.sigmoid(gates[:, 0:H])
        f = jax.nn.sigmoid(gates[:, H:2 * H])
        g = jnp.tanh(gates[:, 2 * H:3 * H])
        o = jax.nn.sigmoid(gates[:, 3 * H:4 * H])
        c_new = f * c + i * g
        h_new = o * jnp.tanh(c_new)
        return h_new, c_new

    def step(t, carry):
        hf, cf, hb, cb = carry
        xf = x_ref[t]              # forward direction:  x[t]      -> (B, D)
        xb = x_ref[T - 1 - t]      # backward direction: x[T-1-t]  -> (B, D)
        # Single fused MXU matmul for both directions' input+recurrent terms.
        inp = jnp.concatenate([xf, hf, xb, hb], axis=-1)          # (B, 2D+2H)
        gates = (jnp.dot(inp, w_lstm, preferred_element_type=jnp.float32)
                 + b_lstm)                                        # (B, 8H)
        hf, cf = lstm_cell(gates[:, 0:4 * H], cf)
        hb, cb = lstm_cell(gates[:, 4 * H:8 * H], cb)
        return hf, cf, hb, cb

    z0 = jnp.zeros((B, H), jnp.float32)
    hf, _, hb, _ = jax.lax.fori_loop(0, T, step, (z0, z0, z0, z0), unroll=True)

    # ---- fused head: [mu_lin | std_lin] = h_cat @ [wmu | wstd] + [bmu | bstd]
    h_cat = jnp.concatenate([hf, hb], axis=-1)                    # (B, 2H)
    proj = (jnp.dot(h_cat, w_head_ref[...],
                    preferred_element_type=jnp.float32)
            + b_head_ref[...])                                    # (B, 2L)
    mu_lin = proj[:, 0:L]
    std_lin = proj[:, L:2 * L]

    # LayerNorm over last dim, elementwise_affine=False, eps=1e-5
    mean = jnp.mean(mu_lin, axis=-1, keepdims=True)
    var = jnp.mean((mu_lin - mean) ** 2, axis=-1, keepdims=True)
    mu = (mu_lin - mean) * jax.lax.rsqrt(var + 1e-5)

    std = jax.nn.softplus(std_lin)
    z = mu + eps_ref[...] * std

    # One packed, lane-contiguous store instead of three tiny masked stores.
    out_ref[...] = jnp.concatenate([z, mu, std], axis=-1)         # (B, 3L)


# ---------------------------------------------------------------------------
# Wrapper
# ---------------------------------------------------------------------------
@jax.jit
def encoder_forward(x, params, eps):
    """x: (B, T, D) float32. Returns (z, mu, std), each (B, latent_dim)."""
    B, T, D = x.shape
    H = params["whh_f"].shape[0]          # (H, 4H)
    L = params["wmu"].shape[1]            # (2H, L)

    x_tbd = jnp.transpose(x, (1, 0, 2))   # (T, B, D), time-major for the kernel

    # Block-diagonal fused LSTM weight:
    #   rows [wih_f; whh_f; wih_b; whh_b], cols [fwd 4H | bwd 4H]
    z_d = jnp.zeros((D, 4 * H), jnp.float32)
    z_h = jnp.zeros((H, 4 * H), jnp.float32)
    w_lstm = jnp.concatenate([
        jnp.concatenate([params["wih_f"], z_d], axis=1),
        jnp.concatenate([params["whh_f"], z_h], axis=1),
        jnp.concatenate([z_d, params["wih_b"]], axis=1),
        jnp.concatenate([z_h, params["whh_b"]], axis=1),
    ], axis=0)                                                     # (2D+2H, 8H)
    b_lstm = jnp.concatenate([params["b_f"], params["b_b"]], axis=1)   # (1, 8H)
    w_head = jnp.concatenate([params["wmu"], params["wstd"]], axis=1)  # (2H, 2L)
    b_head = jnp.concatenate([params["bmu"], params["bstd"]], axis=1)  # (1, 2L)

    vmem = pl.BlockSpec(memory_space=pltpu.MemorySpace.VMEM)
    out = pl.pallas_call(
        encoder_kernel,
        out_shape=jax.ShapeDtypeStruct((B, 3 * L), jnp.float32),
        in_specs=[vmem] * 6,
        out_specs=vmem,
    )(x_tbd, w_lstm, b_lstm, w_head, b_head, eps)

    z = out[:, 0:L]
    mu = out[:, L:2 * L]
    std = out[:, 2 * L:3 * L]
    return z, mu, std


def make_params(key, input_size, hidden_size, latent_dim):
    """Deterministic parameter init (PyTorch-style uniform ranges)."""
    ks = jax.random.split(key, 12)
    kH = 1.0 / jnp.sqrt(hidden_size)
    kL = 1.0 / jnp.sqrt(2 * hidden_size)
    u = lambda k, shape, a: jax.random.uniform(k, shape, jnp.float32, -a, a)
    H, D, L = hidden_size, input_size, latent_dim
    params = {
        # LSTM weights, stored transposed so the kernel does x @ W : (D,4H)/(H,4H)
        "wih_f": u(ks[0], (D, 4 * H), kH),
        "whh_f": u(ks[1], (H, 4 * H), kH),
        "b_f": (u(ks[2], (1, 4 * H), kH) + u(ks[3], (1, 4 * H), kH)),  # b_ih+b_hh
        "wih_b": u(ks[4], (D, 4 * H), kH),
        "whh_b": u(ks[5], (H, 4 * H), kH),
        "b_b": (u(ks[6], (1, 4 * H), kH) + u(ks[7], (1, 4 * H), kH)),
        # Linear heads, stored transposed: (2H, L)
        "wmu": u(ks[8], (2 * H, L), kL),
        "bmu": u(ks[9], (1, L), kL),
        "wstd": u(ks[10], (2 * H, L), kL),
        "bstd": u(ks[11], (1, L), kL),
    }
    return params


# ---------------------------------------------------------------------------
# Pure-JAX reference (for correctness check)
# ---------------------------------------------------------------------------
def ref_forward(x, params, eps):
    B, T, D = x.shape
    H = params["whh_f"].shape[0]

    def run_dir(xs_tbd, wih, whh, b):
        def step(carry, xt):
            h, c = carry
            gates = xt @ wih + h @ whh + b
            i = jax.nn.sigmoid(gates[:, :H])
            f = jax.nn.sigmoid(gates[:, H:2 * H])
            g = jnp.tanh(gates[:, 2 * H:3 * H])
            o = jax.nn.sigmoid(gates[:, 3 * H:])
            c = f * c + i * g
            h = o * jnp.tanh(c)
            return (h, c), None
        init = (jnp.zeros((B, H), jnp.float32), jnp.zeros((B, H), jnp.float32))
        (h, _), _ = jax.lax.scan(step, init, xs_tbd)
        return h

    x_tbd = jnp.transpose(x, (1, 0, 2))
    h_f = run_dir(x_tbd, params["wih_f"], params["whh_f"], params["b_f"])
    h_b = run_dir(x_tbd[::-1], params["wih_b"], params["whh_b"], params["b_b"])
    h_cat = jnp.concatenate([h_f, h_b], axis=-1)

    mu_lin = h_cat @ params["wmu"] + params["bmu"]
    mean = jnp.mean(mu_lin, -1, keepdims=True)
    var = jnp.mean((mu_lin - mean) ** 2, -1, keepdims=True)
    mu = (mu_lin - mean) / jnp.sqrt(var + 1e-5)
    std = jax.nn.softplus(h_cat @ params["wstd"] + params["bstd"])
    z = mu + eps * std
    return z, mu, std


if __name__ == "__main__":
    B, T, D, H, L = 2, 8, 16, 32, 8   # batch, seq, input_size, hidden, latent

    key = jax.random.PRNGKey(0)
    k_x, k_p, k_eps = jax.random.split(key, 3)

    x = jax.random.normal(k_x, (B, T, D), jnp.float32)
    params = make_params(k_p, D, H, L)
    eps = jax.random.normal(k_eps, (B, L), jnp.float32)  # reparameterization noise

    z, mu, std = encoder_forward(x, params, eps)
    jax.block_until_ready((z, mu, std))

    z_r, mu_r, std_r = ref_forward(x, params, eps)
    assert jnp.allclose(z, z_r, rtol=1e-4, atol=1e-4)
    assert jnp.allclose(mu, mu_r, rtol=1e-4, atol=1e-4)
    assert jnp.allclose(std, std_r, rtol=1e-4, atol=1e-4)

    print("KERNEL_OK")
</pallas_src>

<mosaic_0001>
module attributes {stable_mosaic.version = 11 : i64} {
  func.func @encoder_kernel(%arg0: memref<8x2x16xf32, #tpu.memory_space<vmem>>, %arg1: memref<96x256xf32, #tpu.memory_space<vmem>>, %arg2: memref<1x256xf32, #tpu.memory_space<vmem>>, %arg3: memref<64x16xf32, #tpu.memory_space<vmem>>, %arg4: memref<1x16xf32, #tpu.memory_space<vmem>>, %arg5: memref<2x8xf32, #tpu.memory_space<vmem>>, %arg6: memref<2x24xf32, #tpu.memory_space<vmem>>) attributes {dimension_semantics = [], scalar_prefetch = 0 : i64, scratch_operands = 0 : i64, tpu.core_type = #tpu.core_type<tc>} {
    %c0 = arith.constant 0 : index
    %c0_0 = arith.constant 0 : index
    %0 = vector.load %arg1[%c0, %c0_0] : memref<96x256xf32, #tpu.memory_space<vmem>>, vector<96x256xf32>
    %c0_1 = arith.constant 0 : index
    %c0_2 = arith.constant 0 : index
    %1 = vector.load %arg2[%c0_1, %c0_2] : memref<1x256xf32, #tpu.memory_space<vmem>>, vector<1x256xf32>
    %cst = arith.constant 0.000000e+00 : f32
    %2 = vector.broadcast %cst : f32 to vector<2x32xf32>
    %c0_i32 = arith.constant 0 : i32
    %3 = arith.index_cast %c0_i32 : i32 to index
    %c0_3 = arith.constant 0 : index
    %c0_4 = arith.constant 0 : index
    %4 = vector.load %arg0[%3, %c0_3, %c0_4] : memref<8x2x16xf32, #tpu.memory_space<vmem>>, vector<1x2x16xf32>
    %5 = vector.shape_cast %4 : vector<1x2x16xf32> to vector<2x16xf32>
    %c7_i32 = arith.constant 7 : i32
    %6 = arith.subi %c7_i32, %c0_i32 : i32
    %7 = arith.index_cast %6 : i32 to index
    %c0_5 = arith.constant 0 : index
    %c0_6 = arith.constant 0 : index
    %8 = vector.load %arg0[%7, %c0_5, %c0_6] : memref<8x2x16xf32, #tpu.memory_space<vmem>>, vector<1x2x16xf32>
    %9 = vector.shape_cast %8 : vector<1x2x16xf32> to vector<2x16xf32>
    %10 = tpu.concatenate %5, %2, %9, %2 in 1 : vector<2x16xf32>, vector<2x32xf32>, vector<2x16xf32>, vector<2x32xf32> -> vector<2x96xf32>
    %cst_7 = arith.constant dense<0.000000e+00> : vector<2x256xf32>
    %11 = tpu.matmul %10, %0, %cst_7 {dimension_numbers = #tpu.dot_dimension_numbers<[1], [0], [0], [1], [0, 0, 1, 1], [], []>} : vector<2x96xf32>, vector<96x256xf32>, vector<2x256xf32> -> vector<2x256xf32>
    %12 = vector.broadcast %1 : vector<1x256xf32> to vector<2x256xf32>
    %13 = arith.addf %11, %12 : vector<2x256xf32>
    %14 = vector.extract_strided_slice %13 {offsets = [0, 0], sizes = [2, 128], strides = [1, 1]} : vector<2x256xf32> to vector<2x128xf32>
    %15 = vector.extract_strided_slice %14 {offsets = [0, 0], sizes = [2, 32], strides = [1, 1]} : vector<2x128xf32> to vector<2x32xf32>
    %16 = arith.negf %15 : vector<2x32xf32>
    %17 = math.exp %16 : vector<2x32xf32>
    %cst_8 = arith.constant 1.000000e+00 : f32
    %18 = vector.broadcast %cst_8 : f32 to vector<2x32xf32>
    %19 = arith.addf %18, %17 : vector<2x32xf32>
    %20 = arith.divf %18, %19 : vector<2x32xf32>
    %21 = vector.extract_strided_slice %14 {offsets = [0, 32], sizes = [2, 32], strides = [1, 1]} : vector<2x128xf32> to vector<2x32xf32>
    %22 = arith.negf %21 : vector<2x32xf32>
    %23 = math.exp %22 : vector<2x32xf32>
    %cst_9 = arith.constant 1.000000e+00 : f32
    %24 = vector.broadcast %cst_9 : f32 to vector<2x32xf32>
    %25 = arith.addf %24, %23 : vector<2x32xf32>
    %26 = arith.divf %24, %25 : vector<2x32xf32>
    %27 = vector.extract_strided_slice %14 {offsets = [0, 64], sizes = [2, 32], strides = [1, 1]} : vector<2x128xf32> to vector<2x32xf32>
    %28 = math.tanh %27 : vector<2x32xf32>
    %29 = vector.extract_strided_slice %14 {offsets = [0, 96], sizes = [2, 32], strides = [1, 1]} : vector<2x128xf32> to vector<2x32xf32>
    %30 = arith.negf %29 : vector<2x32xf32>
    %31 = math.exp %30 : vector<2x32xf32>
    %cst_10 = arith.constant 1.000000e+00 : f32
    %32 = vector.broadcast %cst_10 : f32 to vector<2x32xf32>
    %33 = arith.addf %32, %31 : vector<2x32xf32>
    %34 = arith.divf %32, %33 : vector<2x32xf32>
    %35 = arith.mulf %26, %2 : vector<2x32xf32>
    %36 = arith.mulf %20, %28 : vector<2x32xf32>
    %37 = arith.addf %35, %36 : vector<2x32xf32>
    %38 = math.tanh %37 : vector<2x32xf32>
    %39 = arith.mulf %34, %38 : vector<2x32xf32>
    %40 = vector.extract_strided_slice %13 {offsets = [0, 128], sizes = [2, 128], strides = [1, 1]} : vector<2x256xf32> to vector<2x128xf32>
    %41 = vector.extract_strided_slice %40 {offsets = [0, 0], sizes = [2, 32], strides = [1, 1]} : vector<2x128xf32> to vector<2x32xf32>
    %42 = arith.negf %41 : vector<2x32xf32>
    %43 = math.exp %42 : vector<2x32xf32>
    %cst_11 = arith.constant 1.000000e+00 : f32
    %44 = vector.broadcast %cst_11 : f32 to vector<2x32xf32>
    %45 = arith.addf %44, %43 : vector<2x32xf32>
    %46 = arith.divf %44, %45 : vector<2x32xf32>
    %47 = vector.extract_strided_slice %40 {offsets = [0, 32], sizes = [2, 32], strides = [1, 1]} : vector<2x128xf32> to vector<2x32xf32>
    %48 = arith.negf %47 : vector<2x32xf32>
    %49 = math.exp %48 : vector<2x32xf32>
    %cst_12 = arith.constant 1.000000e+00 : f32
    %50 = vector.broadcast %cst_12 : f32 to vector<2x32xf32>
    %51 = arith.addf %50, %49 : vector<2x32xf32>
    %52 = arith.divf %50, %51 : vector<2x32xf32>
    %53 = vector.extract_strided_slice %40 {offsets = [0, 64], sizes = [2, 32], strides = [1, 1]} : vector<2x128xf32> to vector<2x32xf32>
    %54 = math.tanh %53 : vector<2x32xf32>
    %55 = vector.extract_strided_slice %40 {offsets = [0, 96], sizes = [2, 32], strides = [1, 1]} : vector<2x128xf32> to vector<2x32xf32>
    %56 = arith.negf %55 : vector<2x32xf32>
    %57 = math.exp %56 : vector<2x32xf32>
    %cst_13 = arith.constant 1.000000e+00 : f32
    %58 = vector.broadcast %cst_13 : f32 to vector<2x32xf32>
    %59 = arith.addf %58, %57 : vector<2x32xf32>
    %60 = arith.divf %58, %59 : vector<2x32xf32>
    %61 = arith.mulf %52, %2 : vector<2x32xf32>
    %62 = arith.mulf %46, %54 : vector<2x32xf32>
    %63 = arith.addf %61, %62 : vector<2x32xf32>
    %64 = math.tanh %63 : vector<2x32xf32>
    %65 = arith.mulf %60, %64 : vector<2x32xf32>
    %c1_i32 = arith.constant 1 : i32
    %66 = arith.index_cast %c1_i32 : i32 to index
    %c0_14 = arith.constant 0 : index
    %c0_15 = arith.constant 0 : index
    %67 = vector.load %arg0[%66, %c0_14, %c0_15] : memref<8x2x16xf32, #tpu.memory_space<vmem>>, vector<1x2x16xf32>
    %68 = vector.shape_cast %67 : vector<1x2x16xf32> to vector<2x16xf32>
    %c7_i32_16 = arith.constant 7 : i32
    %69 = arith.subi %c7_i32_16, %c1_i32 : i32
    %70 = arith.index_cast %69 : i32 to index
    %c0_17 = arith.constant 0 : index
    %c0_18 = arith.constant 0 : index
    %71 = vector.load %arg0[%70, %c0_17, %c0_18] : memref<8x2x16xf32, #tpu.memory_space<vmem>>, vector<1x2x16xf32>
    %72 = vector.shape_cast %71 : vector<1x2x16xf32> to vector<2x16xf32>
    %73 = tpu.concatenate %68, %39, %72, %65 in 1 : vector<2x16xf32>, vector<2x32xf32>, vector<2x16xf32>, vector<2x32xf32> -> vector<2x96xf32>
    %cst_19 = arith.constant dense<0.000000e+00> : vector<2x256xf32>
    %74 = tpu.matmul %73, %0, %cst_19 {dimension_numbers = #tpu.dot_dimension_numbers<[1], [0], [0], [1], [0, 0, 1, 1], [], []>} : vector<2x96xf32>, vector<96x256xf32>, vector<2x256xf32> -> vector<2x256xf32>
    %75 = vector.broadcast %1 : vector<1x256xf32> to vector<2x256xf32>
    %76 = arith.addf %74, %75 : vector<2x256xf32>
    %77 = vector.extract_strided_slice %76 {offsets = [0, 0], sizes = [2, 128], strides = [1, 1]} : vector<2x256xf32> to vector<2x128xf32>
    %78 = vector.extract_strided_slice %77 {offsets = [0, 0], sizes = [2, 32], strides = [1, 1]} : vector<2x128xf32> to vector<2x32xf32>
    %79 = arith.negf %78 : vector<2x32xf32>
    %80 = math.exp %79 : vector<2x32xf32>
    %cst_20 = arith.constant 1.000000e+00 : f32
    %81 = vector.broadcast %cst_20 : f32 to vector<2x32xf32>
    %82 = arith.addf %81, %80 : vector<2x32xf32>
    %83 = arith.divf %81, %82 : vector<2x32xf32>
    %84 = vector.extract_strided_slice %77 {offsets = [0, 32], sizes = [2, 32], strides = [1, 1]} : vector<2x128xf32> to vector<2x32xf32>
    %85 = arith.negf %84 : vector<2x32xf32>
    %86 = math.exp %85 : vector<2x32xf32>
    %cst_21 = arith.constant 1.000000e+00 : f32
    %87 = vector.broadcast %cst_21 : f32 to vector<2x32xf32>
    %88 = arith.addf %87, %86 : vector<2x32xf32>
    %89 = arith.divf %87, %88 : vector<2x32xf32>
    %90 = vector.extract_strided_slice %77 {offsets = [0, 64], sizes = [2, 32], strides = [1, 1]} : vector<2x128xf32> to vector<2x32xf32>
    %91 = math.tanh %90 : vector<2x32xf32>
    %92 = vector.extract_strided_slice %77 {offsets = [0, 96], sizes = [2, 32], strides = [1, 1]} : vector<2x128xf32> to vector<2x32xf32>
    %93 = arith.negf %92 : vector<2x32xf32>
    %94 = math.exp %93 : vector<2x32xf32>
    %cst_22 = arith.constant 1.000000e+00 : f32
    %95 = vector.broadcast %cst_22 : f32 to vector<2x32xf32>
    %96 = arith.addf %95, %94 : vector<2x32xf32>
    %97 = arith.divf %95, %96 : vector<2x32xf32>
    %98 = arith.mulf %89, %37 : vector<2x32xf32>
    %99 = arith.mulf %83, %91 : vector<2x32xf32>
    %100 = arith.addf %98, %99 : vector<2x32xf32>
    %101 = math.tanh %100 : vector<2x32xf32>
    %102 = arith.mulf %97, %101 : vector<2x32xf32>
    %103 = vector.extract_strided_slice %76 {offsets = [0, 128], sizes = [2, 128], strides = [1, 1]} : vector<2x256xf32> to vector<2x128xf32>
    %104 = vector.extract_strided_slice %103 {offsets = [0, 0], sizes = [2, 32], strides = [1, 1]} : vector<2x128xf32> to vector<2x32xf32>
    %105 = arith.negf %104 : vector<2x32xf32>
    %106 = math.exp %105 : vector<2x32xf32>
    %cst_23 = arith.constant 1.000000e+00 : f32
    %107 = vector.broadcast %cst_23 : f32 to vector<2x32xf32>
    %108 = arith.addf %107, %106 : vector<2x32xf32>
    %109 = arith.divf %107, %108 : vector<2x32xf32>
    %110 = vector.extract_strided_slice %103 {offsets = [0, 32], sizes = [2, 32], strides = [1, 1]} : vector<2x128xf32> to vector<2x32xf32>
    %111 = arith.negf %110 : vector<2x32xf32>
    %112 = math.exp %111 : vector<2x32xf32>
    %cst_24 = arith.constant 1.000000e+00 : f32
    %113 = vector.broadcast %cst_24 : f32 to vector<2x32xf32>
    %114 = arith.addf %113, %112 : vector<2x32xf32>
    %115 = arith.divf %113, %114 : vector<2x32xf32>
    %116 = vector.extract_strided_slice %103 {offsets = [0, 64], sizes = [2, 32], strides = [1, 1]} : vector<2x128xf32> to vector<2x32xf32>
    %117 = math.tanh %116 : vector<2x32xf32>
    %118 = vector.extract_strided_slice %103 {offsets = [0, 96], sizes = [2, 32], strides = [1, 1]} : vector<2x128xf32> to vector<2x32xf32>
    %119 = arith.negf %118 : vector<2x32xf32>
    %120 = math.exp %119 : vector<2x32xf32>
    %cst_25 = arith.constant 1.000000e+00 : f32
    %121 = vector.broadcast %cst_25 : f32 to vector<2x32xf32>
    %122 = arith.addf %121, %120 : vector<2x32xf32>
    %123 = arith.divf %121, %122 : vector<2x32xf32>
    %124 = arith.mulf %115, %63 : vector<2x32xf32>
    %125 = arith.mulf %109, %117 : vector<2x32xf32>
    %126 = arith.addf %124, %125 : vector<2x32xf32>
    %127 = math.tanh %126 : vector<2x32xf32>
    %128 = arith.mulf %123, %127 : vector<2x32xf32>
    %c2_i32 = arith.constant 2 : i32
    %129 = arith.index_cast %c2_i32 : i32 to index
    %c0_26 = arith.constant 0 : index
    %c0_27 = arith.constant 0 : index
    %130 = vector.load %arg0[%129, %c0_26, %c0_27] : memref<8x2x16xf32, #tpu.memory_space<vmem>>, vector<1x2x16xf32>
    %131 = vector.shape_cast %130 : vector<1x2x16xf32> to vector<2x16xf32>
    %c7_i32_28 = arith.constant 7 : i32
    %132 = arith.subi %c7_i32_28, %c2_i32 : i32
    %133 = arith.index_cast %132 : i32 to index
    %c0_29 = arith.constant 0 : index
    %c0_30 = arith.constant 0 : index
    %134 = vector.load %arg0[%133, %c0_29, %c0_30] : memref<8x2x16xf32, #tpu.memory_space<vmem>>, vector<1x2x16xf32>
    %135 = vector.shape_cast %134 : vector<1x2x16xf32> to vector<2x16xf32>
    %136 = tpu.concatenate %131, %102, %135, %128 in 1 : vector<2x16xf32>, vector<2x32xf32>, vector<2x16xf32>, vector<2x32xf32> -> vector<2x96xf32>
    %cst_31 = arith.constant dense<0.000000e+00> : vector<2x256xf32>
    %137 = tpu.matmul %136, %0, %cst_31 {dimension_numbers = #tpu.dot_dimension_numbers<[1], [0], [0], [1], [0, 0, 1, 1], [], []>} : vector<2x96xf32>, vector<96x256xf32>, vector<2x256xf32> -> vector<2x256xf32>
    %138 = vector.broadcast %1 : vector<1x256xf32> to vector<2x256xf32>
    %139 = arith.addf %137, %138 : vector<2x256xf32>
    %140 = vector.extract_strided_slice %139 {offsets = [0, 0], sizes = [2, 128], strides = [1, 1]} : vector<2x256xf32> to vector<2x128xf32>
    %141 = vector.extract_strided_slice %140 {offsets = [0, 0], sizes = [2, 32], strides = [1, 1]} : vector<2x128xf32> to vector<2x32xf32>
    %142 = arith.negf %141 : vector<2x32xf32>
    %143 = math.exp %142 : vector<2x32xf32>
    %cst_32 = arith.constant 1.000000e+00 : f32
    %144 = vector.broadcast %cst_32 : f32 to vector<2x32xf32>
    %145 = arith.addf %144, %143 : vector<2x32xf32>
    %146 = arith.divf %144, %145 : vector<2x32xf32>
    %147 = vector.extract_strided_slice %140 {offsets = [0, 32], sizes = [2, 32], strides = [1, 1]} : vector<2x128xf32> to vector<2x32xf32>
    %148 = arith.negf %147 : vector<2x32xf32>
    %149 = math.exp %148 : vector<2x32xf32>
    %cst_33 = arith.constant 1.000000e+00 : f32
    %150 = vector.broadcast %cst_33 : f32 to vector<2x32xf32>
    %151 = arith.addf %150, %149 : vector<2x32xf32>
    %152 = arith.divf %150, %151 : vector<2x32xf32>
    %153 = vector.extract_strided_slice %140 {offsets = [0, 64], sizes = [2, 32], strides = [1, 1]} : vector<2x128xf32> to vector<2x32xf32>
    %154 = math.tanh %153 : vector<2x32xf32>
    %155 = vector.extract_strided_slice %140 {offsets = [0, 96], sizes = [2, 32], strides = [1, 1]} : vector<2x128xf32> to vector<2x32xf32>
    %156 = arith.negf %155 : vector<2x32xf32>
    %157 = math.exp %156 : vector<2x32xf32>
    %cst_34 = arith.constant 1.000000e+00 : f32
    %158 = vector.broadcast %cst_34 : f32 to vector<2x32xf32>
    %159 = arith.addf %158, %157 : vector<2x32xf32>
    %160 = arith.divf %158, %159 : vector<2x32xf32>
    %161 = arith.mulf %152, %100 : vector<2x32xf32>
    %162 = arith.mulf %146, %154 : vector<2x32xf32>
    %163 = arith.addf %161, %162 : vector<2x32xf32>
    %164 = math.tanh %163 : vector<2x32xf32>
    %165 = arith.mulf %160, %164 : vector<2x32xf32>
    %166 = vector.extract_strided_slice %139 {offsets = [0, 128], sizes = [2, 128], strides = [1, 1]} : vector<2x256xf32> to vector<2x128xf32>
    %167 = vector.extract_strided_slice %166 {offsets = [0, 0], sizes = [2, 32], strides = [1, 1]} : vector<2x128xf32> to vector<2x32xf32>
    %168 = arith.negf %167 : vector<2x32xf32>
    %169 = math.exp %168 : vector<2x32xf32>
    %cst_35 = arith.constant 1.000000e+00 : f32
    %170 = vector.broadcast %cst_35 : f32 to vector<2x32xf32>
    %171 = arith.addf %170, %169 : vector<2x32xf32>
    %172 = arith.divf %170, %171 : vector<2x32xf32>
    %173 = vector.extract_strided_slice %166 {offsets = [0, 32], sizes = [2, 32], strides = [1, 1]} : vector<2x128xf32> to vector<2x32xf32>
    %174 = arith.negf %173 : vector<2x32xf32>
    %175 = math.exp %174 : vector<2x32xf32>
    %cst_36 = arith.constant 1.000000e+00 : f32
    %176 = vector.broadcast %cst_36 : f32 to vector<2x32xf32>
    %177 = arith.addf %176, %175 : vector<2x32xf32>
    %178 = arith.divf %176, %177 : vector<2x32xf32>
    %179 = vector.extract_strided_slice %166 {offsets = [0, 64], sizes = [2, 32], strides = [1, 1]} : vector<2x128xf32> to vector<2x32xf32>
    %180 = math.tanh %179 : vector<2x32xf32>
    %181 = vector.extract_strided_slice %166 {offsets = [0, 96], sizes = [2, 32], strides = [1, 1]} : vector<2x128xf32> to vector<2x32xf32>
    %182 = arith.negf %181 : vector<2x32xf32>
    %183 = math.exp %182 : vector<2x32xf32>
    %cst_37 = arith.constant 1.000000e+00 : f32
    %184 = vector.broadcast %cst_37 : f32 to vector<2x32xf32>
    %185 = arith.addf %184, %183 : vector<2x32xf32>
    %186 = arith.divf %184, %185 : vector<2x32xf32>
    %187 = arith.mulf %178, %126 : vector<2x32xf32>
    %188 = arith.mulf %172, %180 : vector<2x32xf32>
    %189 = arith.addf %187, %188 : vector<2x32xf32>
    %190 = math.tanh %189 : vector<2x32xf32>
    %191 = arith.mulf %186, %190 : vector<2x32xf32>
    %c3_i32 = arith.constant 3 : i32
    %192 = arith.index_cast %c3_i32 : i32 to index
    %c0_38 = arith.constant 0 : index
    %c0_39 = arith.constant 0 : index
    %193 = vector.load %arg0[%192, %c0_38, %c0_39] : memref<8x2x16xf32, #tpu.memory_space<vmem>>, vector<1x2x16xf32>
    %194 = vector.shape_cast %193 : vector<1x2x16xf32> to vector<2x16xf32>
    %c7_i32_40 = arith.constant 7 : i32
    %195 = arith.subi %c7_i32_40, %c3_i32 : i32
    %196 = arith.index_cast %195 : i32 to index
    %c0_41 = arith.constant 0 : index
    %c0_42 = arith.constant 0 : index
    %197 = vector.load %arg0[%196, %c0_41, %c0_42] : memref<8x2x16xf32, #tpu.memory_space<vmem>>, vector<1x2x16xf32>
    %198 = vector.shape_cast %197 : vector<1x2x16xf32> to vector<2x16xf32>
    %199 = tpu.concatenate %194, %165, %198, %191 in 1 : vector<2x16xf32>, vector<2x32xf32>, vector<2x16xf32>, vector<2x32xf32> -> vector<2x96xf32>
    %cst_43 = arith.constant dense<0.000000e+00> : vector<2x256xf32>
    %200 = tpu.matmul %199, %0, %cst_43 {dimension_numbers = #tpu.dot_dimension_numbers<[1], [0], [0], [1], [0, 0, 1, 1], [], []>} : vector<2x96xf32>, vector<96x256xf32>, vector<2x256xf32> -> vector<2x256xf32>
    %201 = vector.broadcast %1 : vector<1x256xf32> to vector<2x256xf32>
    %202 = arith.addf %200, %201 : vector<2x256xf32>
    %203 = vector.extract_strided_slice %202 {offsets = [0, 0], sizes = [2, 128], strides = [1, 1]} : vector<2x256xf32> to vector<2x128xf32>
    %204 = vector.extract_strided_slice %203 {offsets = [0, 0], sizes = [2, 32], strides = [1, 1]} : vector<2x128xf32> to vector<2x32xf32>
    %205 = arith.negf %204 : vector<2x32xf32>
    %206 = math.exp %205 : vector<2x32xf32>
    %cst_44 = arith.constant 1.000000e+00 : f32
    %207 = vector.broadcast %cst_44 : f32 to vector<2x32xf32>
    %208 = arith.addf %207, %206 : vector<2x32xf32>
    %209 = arith.divf %207, %208 : vector<2x32xf32>
    %210 = vector.extract_strided_slice %203 {offsets = [0, 32], sizes = [2, 32], strides = [1, 1]} : vector<2x128xf32> to vector<2x32xf32>
    %211 = arith.negf %210 : vector<2x32xf32>
    %212 = math.exp %211 : vector<2x32xf32>
    %cst_45 = arith.constant 1.000000e+00 : f32
    %213 = vector.broadcast %cst_45 : f32 to vector<2x32xf32>
    %214 = arith.addf %213, %212 : vector<2x32xf32>
    %215 = arith.divf %213, %214 : vector<2x32xf32>
    %216 = vector.extract_strided_slice %203 {offsets = [0, 64], sizes = [2, 32], strides = [1, 1]} : vector<2x128xf32> to vector<2x32xf32>
    %217 = math.tanh %216 : vector<2x32xf32>
    %218 = vector.extract_strided_slice %203 {offsets = [0, 96], sizes = [2, 32], strides = [1, 1]} : vector<2x128xf32> to vector<2x32xf32>
    %219 = arith.negf %218 : vector<2x32xf32>
    %220 = math.exp %219 : vector<2x32xf32>
    %cst_46 = arith.constant 1.000000e+00 : f32
    %221 = vector.broadcast %cst_46 : f32 to vector<2x32xf32>
    %222 = arith.addf %221, %220 : vector<2x32xf32>
    %223 = arith.divf %221, %222 : vector<2x32xf32>
    %224 = arith.mulf %215, %163 : vector<2x32xf32>
    %225 = arith.mulf %209, %217 : vector<2x32xf32>
    %226 = arith.addf %224, %225 : vector<2x32xf32>
    %227 = math.tanh %226 : vector<2x32xf32>
    %228 = arith.mulf %223, %227 : vector<2x32xf32>
    %229 = vector.extract_strided_slice %202 {offsets = [0, 128], sizes = [2, 128], strides = [1, 1]} : vector<2x256xf32> to vector<2x128xf32>
    %230 = vector.extract_strided_slice %229 {offsets = [0, 0], sizes = [2, 32], strides = [1, 1]} : vector<2x128xf32> to vector<2x32xf32>
    %231 = arith.negf %230 : vector<2x32xf32>
    %232 = math.exp %231 : vector<2x32xf32>
    %cst_47 = arith.constant 1.000000e+00 : f32
    %233 = vector.broadcast %cst_47 : f32 to vector<2x32xf32>
    %234 = arith.addf %233, %232 : vector<2x32xf32>
    %235 = arith.divf %233, %234 : vector<2x32xf32>
    %236 = vector.extract_strided_slice %229 {offsets = [0, 32], sizes = [2, 32], strides = [1, 1]} : vector<2x128xf32> to vector<2x32xf32>
    %237 = arith.negf %236 : vector<2x32xf32>
    %238 = math.exp %237 : vector<2x32xf32>
    %cst_48 = arith.constant 1.000000e+00 : f32
    %239 = vector.broadcast %cst_48 : f32 to vector<2x32xf32>
    %240 = arith.addf %239, %238 : vector<2x32xf32>
    %241 = arith.divf %239, %240 : vector<2x32xf32>
    %242 = vector.extract_strided_slice %229 {offsets = [0, 64], sizes = [2, 32], strides = [1, 1]} : vector<2x128xf32> to vector<2x32xf32>
    %243 = math.tanh %242 : vector<2x32xf32>
    %244 = vector.extract_strided_slice %229 {offsets = [0, 96], sizes = [2, 32], strides = [1, 1]} : vector<2x128xf32> to vector<2x32xf32>
    %245 = arith.negf %244 : vector<2x32xf32>
    %246 = math.exp %245 : vector<2x32xf32>
    %cst_49 = arith.constant 1.000000e+00 : f32
    %247 = vector.broadcast %cst_49 : f32 to vector<2x32xf32>
    %248 = arith.addf %247, %246 : vector<2x32xf32>
    %249 = arith.divf %247, %248 : vector<2x32xf32>
    %250 = arith.mulf %241, %189 : vector<2x32xf32>
    %251 = arith.mulf %235, %243 : vector<2x32xf32>
    %252 = arith.addf %250, %251 : vector<2x32xf32>
    %253 = math.tanh %252 : vector<2x32xf32>
    %254 = arith.mulf %249, %253 : vector<2x32xf32>
    %c4_i32 = arith.constant 4 : i32
    %255 = arith.index_cast %c4_i32 : i32 to index
    %c0_50 = arith.constant 0 : index
    %c0_51 = arith.constant 0 : index
    %256 = vector.load %arg0[%255, %c0_50, %c0_51] : memref<8x2x16xf32, #tpu.memory_space<vmem>>, vector<1x2x16xf32>
    %257 = vector.shape_cast %256 : vector<1x2x16xf32> to vector<2x16xf32>
    %c7_i32_52 = arith.constant 7 : i32
    %258 = arith.subi %c7_i32_52, %c4_i32 : i32
    %259 = arith.index_cast %258 : i32 to index
    %c0_53 = arith.constant 0 : index
    %c0_54 = arith.constant 0 : index
    %260 = vector.load %arg0[%259, %c0_53, %c0_54] : memref<8x2x16xf32, #tpu.memory_space<vmem>>, vector<1x2x16xf32>
    %261 = vector.shape_cast %260 : vector<1x2x16xf32> to vector<2x16xf32>
    %262 = tpu.concatenate %257, %228, %261, %254 in 1 : vector<2x16xf32>, vector<2x32xf32>, vector<2x16xf32>, vector<2x32xf32> -> vector<2x96xf32>
    %cst_55 = arith.constant dense<0.000000e+00> : vector<2x256xf32>
    %263 = tpu.matmul %262, %0, %cst_55 {dimension_numbers = #tpu.dot_dimension_numbers<[1], [0], [0], [1], [0, 0, 1, 1], [], []>} : vector<2x96xf32>, vector<96x256xf32>, vector<2x256xf32> -> vector<2x256xf32>
    %264 = vector.broadcast %1 : vector<1x256xf32> to vector<2x256xf32>
    %265 = arith.addf %263, %264 : vector<2x256xf32>
    %266 = vector.extract_strided_slice %265 {offsets = [0, 0], sizes = [2, 128], strides = [1, 1]} : vector<2x256xf32> to vector<2x128xf32>
    %267 = vector.extract_strided_slice %266 {offsets = [0, 0], sizes = [2, 32], strides = [1, 1]} : vector<2x128xf32> to vector<2x32xf32>
    %268 = arith.negf %267 : vector<2x32xf32>
    %269 = math.exp %268 : vector<2x32xf32>
    %cst_56 = arith.constant 1.000000e+00 : f32
    %270 = vector.broadcast %cst_56 : f32 to vector<2x32xf32>
    %271 = arith.addf %270, %269 : vector<2x32xf32>
    %272 = arith.divf %270, %271 : vector<2x32xf32>
    %273 = vector.extract_strided_slice %266 {offsets = [0, 32], sizes = [2, 32], strides = [1, 1]} : vector<2x128xf32> to vector<2x32xf32>
    %274 = arith.negf %273 : vector<2x32xf32>
    %275 = math.exp %274 : vector<2x32xf32>
    %cst_57 = arith.constant 1.000000e+00 : f32
    %276 = vector.broadcast %cst_57 : f32 to vector<2x32xf32>
    %277 = arith.addf %276, %275 : vector<2x32xf32>
    %278 = arith.divf %276, %277 : vector<2x32xf32>
    %279 = vector.extract_strided_slice %266 {offsets = [0, 64], sizes = [2, 32], strides = [1, 1]} : vector<2x128xf32> to vector<2x32xf32>
    %280 = math.tanh %279 : vector<2x32xf32>
    %281 = vector.extract_strided_slice %266 {offsets = [0, 96], sizes = [2, 32], strides = [1, 1]} : vector<2x128xf32> to vector<2x32xf32>
    %282 = arith.negf %281 : vector<2x32xf32>
    %283 = math.exp %282 : vector<2x32xf32>
    %cst_58 = arith.constant 1.000000e+00 : f32
    %284 = vector.broadcast %cst_58 : f32 to vector<2x32xf32>
    %285 = arith.addf %284, %283 : vector<2x32xf32>
    %286 = arith.divf %284, %285 : vector<2x32xf32>
    %287 = arith.mulf %278, %226 : vector<2x32xf32>
    %288 = arith.mulf %272, %280 : vector<2x32xf32>
    %289 = arith.addf %287, %288 : vector<2x32xf32>
    %290 = math.tanh %289 : vector<2x32xf32>
    %291 = arith.mulf %286, %290 : vector<2x32xf32>
    %292 = vector.extract_strided_slice %265 {offsets = [0, 128], sizes = [2, 128], strides = [1, 1]} : vector<2x256xf32> to vector<2x128xf32>
    %293 = vector.extract_strided_slice %292 {offsets = [0, 0], sizes = [2, 32], strides = [1, 1]} : vector<2x128xf32> to vector<2x32xf32>
    %294 = arith.negf %293 : vector<2x32xf32>
    %295 = math.exp %294 : vector<2x32xf32>
    %cst_59 = arith.constant 1.000000e+00 : f32
    %296 = vector.broadcast %cst_59 : f32 to vector<2x32xf32>
    %297 = arith.addf %296, %295 : vector<2x32xf32>
    %298 = arith.divf %296, %297 : vector<2x32xf32>
    %299 = vector.extract_strided_slice %292 {offsets = [0, 32], sizes = [2, 32], strides = [1, 1]} : vector<2x128xf32> to vector<2x32xf32>
    %300 = arith.negf %299 : vector<2x32xf32>
    %301 = math.exp %300 : vector<2x32xf32>
    %cst_60 = arith.constant 1.000000e+00 : f32
    %302 = vector.broadcast %cst_60 : f32 to vector<2x32xf32>
    %303 = arith.addf %302, %301 : vector<2x32xf32>
    %304 = arith.divf %302, %303 : vector<2x32xf32>
    %305 = vector.extract_strided_slice %292 {offsets = [0, 64], sizes = [2, 32], strides = [1, 1]} : vector<2x128xf32> to vector<2x32xf32>
    %306 = math.tanh %305 : vector<2x32xf32>
    %307 = vector.extract_strided_slice %292 {offsets = [0, 96], sizes = [2, 32], strides = [1, 1]} : vector<2x128xf32> to vector<2x32xf32>
    %308 = arith.negf %307 : vector<2x32xf32>
    %309 = math.exp %308 : vector<2x32xf32>
    %cst_61 = arith.constant 1.000000e+00 : f32
    %310 = vector.broadcast %cst_61 : f32 to vector<2x32xf32>
    %311 = arith.addf %310, %309 : vector<2x32xf32>
    %312 = arith.divf %310, %311 : vector<2x32xf32>
    %313 = arith.mulf %304, %252 : vector<2x32xf32>
    %314 = arith.mulf %298, %306 : vector<2x32xf32>
    %315 = arith.addf %313, %314 : vector<2x32xf32>
    %316 = math.tanh %315 : vector<2x32xf32>
    %317 = arith.mulf %312, %316 : vector<2x32xf32>
    %c5_i32 = arith.constant 5 : i32
    %318 = arith.index_cast %c5_i32 : i32 to index
    %c0_62 = arith.constant 0 : index
    %c0_63 = arith.constant 0 : index
    %319 = vector.load %arg0[%318, %c0_62, %c0_63] : memref<8x2x16xf32, #tpu.memory_space<vmem>>, vector<1x2x16xf32>
    %320 = vector.shape_cast %319 : vector<1x2x16xf32> to vector<2x16xf32>
    %c7_i32_64 = arith.constant 7 : i32
    %321 = arith.subi %c7_i32_64, %c5_i32 : i32
    %322 = arith.index_cast %321 : i32 to index
    %c0_65 = arith.constant 0 : index
    %c0_66 = arith.constant 0 : index
    %323 = vector.load %arg0[%322, %c0_65, %c0_66] : memref<8x2x16xf32, #tpu.memory_space<vmem>>, vector<1x2x16xf32>
    %324 = vector.shape_cast %323 : vector<1x2x16xf32> to vector<2x16xf32>
    %325 = tpu.concatenate %320, %291, %324, %317 in 1 : vector<2x16xf32>, vector<2x32xf32>, vector<2x16xf32>, vector<2x32xf32> -> vector<2x96xf32>
    %cst_67 = arith.constant dense<0.000000e+00> : vector<2x256xf32>
    %326 = tpu.matmul %325, %0, %cst_67 {dimension_numbers = #tpu.dot_dimension_numbers<[1], [0], [0], [1], [0, 0, 1, 1], [], []>} : vector<2x96xf32>, vector<96x256xf32>, vector<2x256xf32> -> vector<2x256xf32>
    %327 = vector.broadcast %1 : vector<1x256xf32> to vector<2x256xf32>
    %328 = arith.addf %326, %327 : vector<2x256xf32>
    %329 = vector.extract_strided_slice %328 {offsets = [0, 0], sizes = [2, 128], strides = [1, 1]} : vector<2x256xf32> to vector<2x128xf32>
    %330 = vector.extract_strided_slice %329 {offsets = [0, 0], sizes = [2, 32], strides = [1, 1]} : vector<2x128xf32> to vector<2x32xf32>
    %331 = arith.negf %330 : vector<2x32xf32>
    %332 = math.exp %331 : vector<2x32xf32>
    %cst_68 = arith.constant 1.000000e+00 : f32
    %333 = vector.broadcast %cst_68 : f32 to vector<2x32xf32>
    %334 = arith.addf %333, %332 : vector<2x32xf32>
    %335 = arith.divf %333, %334 : vector<2x32xf32>
    %336 = vector.extract_strided_slice %329 {offsets = [0, 32], sizes = [2, 32], strides = [1, 1]} : vector<2x128xf32> to vector<2x32xf32>
    %337 = arith.negf %336 : vector<2x32xf32>
    %338 = math.exp %337 : vector<2x32xf32>
    %cst_69 = arith.constant 1.000000e+00 : f32
    %339 = vector.broadcast %cst_69 : f32 to vector<2x32xf32>
    %340 = arith.addf %339, %338 : vector<2x32xf32>
    %341 = arith.divf %339, %340 : vector<2x32xf32>
    %342 = vector.extract_strided_slice %329 {offsets = [0, 64], sizes = [2, 32], strides = [1, 1]} : vector<2x128xf32> to vector<2x32xf32>
    %343 = math.tanh %342 : vector<2x32xf32>
    %344 = vector.extract_strided_slice %329 {offsets = [0, 96], sizes = [2, 32], strides = [1, 1]} : vector<2x128xf32> to vector<2x32xf32>
    %345 = arith.negf %344 : vector<2x32xf32>
    %346 = math.exp %345 : vector<2x32xf32>
    %cst_70 = arith.constant 1.000000e+00 : f32
    %347 = vector.broadcast %cst_70 : f32 to vector<2x32xf32>
    %348 = arith.addf %347, %346 : vector<2x32xf32>
    %349 = arith.divf %347, %348 : vector<2x32xf32>
    %350 = arith.mulf %341, %289 : vector<2x32xf32>
    %351 = arith.mulf %335, %343 : vector<2x32xf32>
    %352 = arith.addf %350, %351 : vector<2x32xf32>
    %353 = math.tanh %352 : vector<2x32xf32>
    %354 = arith.mulf %349, %353 : vector<2x32xf32>
    %355 = vector.extract_strided_slice %328 {offsets = [0, 128], sizes = [2, 128], strides = [1, 1]} : vector<2x256xf32> to vector<2x128xf32>
    %356 = vector.extract_strided_slice %355 {offsets = [0, 0], sizes = [2, 32], strides = [1, 1]} : vector<2x128xf32> to vector<2x32xf32>
    %357 = arith.negf %356 : vector<2x32xf32>
    %358 = math.exp %357 : vector<2x32xf32>
    %cst_71 = arith.constant 1.000000e+00 : f32
    %359 = vector.broadcast %cst_71 : f32 to vector<2x32xf32>
    %360 = arith.addf %359, %358 : vector<2x32xf32>
    %361 = arith.divf %359, %360 : vector<2x32xf32>
    %362 = vector.extract_strided_slice %355 {offsets = [0, 32], sizes = [2, 32], strides = [1, 1]} : vector<2x128xf32> to vector<2x32xf32>
    %363 = arith.negf %362 : vector<2x32xf32>
    %364 = math.exp %363 : vector<2x32xf32>
    %cst_72 = arith.constant 1.000000e+00 : f32
    %365 = vector.broadcast %cst_72 : f32 to vector<2x32xf32>
    %366 = arith.addf %365, %364 : vector<2x32xf32>
    %367 = arith.divf %365, %366 : vector<2x32xf32>
    %368 = vector.extract_strided_slice %355 {offsets = [0, 64], sizes = [2, 32], strides = [1, 1]} : vector<2x128xf32> to vector<2x32xf32>
    %369 = math.tanh %368 : vector<2x32xf32>
    %370 = vector.extract_strided_slice %355 {offsets = [0, 96], sizes = [2, 32], strides = [1, 1]} : vector<2x128xf32> to vector<2x32xf32>
    %371 = arith.negf %370 : vector<2x32xf32>
    %372 = math.exp %371 : vector<2x32xf32>
    %cst_73 = arith.constant 1.000000e+00 : f32
    %373 = vector.broadcast %cst_73 : f32 to vector<2x32xf32>
    %374 = arith.addf %373, %372 : vector<2x32xf32>
    %375 = arith.divf %373, %374 : vector<2x32xf32>
    %376 = arith.mulf %367, %315 : vector<2x32xf32>
    %377 = arith.mulf %361, %369 : vector<2x32xf32>
    %378 = arith.addf %376, %377 : vector<2x32xf32>
    %379 = math.tanh %378 : vector<2x32xf32>
    %380 = arith.mulf %375, %379 : vector<2x32xf32>
    %c6_i32 = arith.constant 6 : i32
    %381 = arith.index_cast %c6_i32 : i32 to index
    %c0_74 = arith.constant 0 : index
    %c0_75 = arith.constant 0 : index
    %382 = vector.load %arg0[%381, %c0_74, %c0_75] : memref<8x2x16xf32, #tpu.memory_space<vmem>>, vector<1x2x16xf32>
    %383 = vector.shape_cast %382 : vector<1x2x16xf32> to vector<2x16xf32>
    %c7_i32_76 = arith.constant 7 : i32
    %384 = arith.subi %c7_i32_76, %c6_i32 : i32
    %385 = arith.index_cast %384 : i32 to index
    %c0_77 = arith.constant 0 : index
    %c0_78 = arith.constant 0 : index
    %386 = vector.load %arg0[%385, %c0_77, %c0_78] : memref<8x2x16xf32, #tpu.memory_space<vmem>>, vector<1x2x16xf32>
    %387 = vector.shape_cast %386 : vector<1x2x16xf32> to vector<2x16xf32>
    %388 = tpu.concatenate %383, %354, %387, %380 in 1 : vector<2x16xf32>, vector<2x32xf32>, vector<2x16xf32>, vector<2x32xf32> -> vector<2x96xf32>
    %cst_79 = arith.constant dense<0.000000e+00> : vector<2x256xf32>
    %389 = tpu.matmul %388, %0, %cst_79 {dimension_numbers = #tpu.dot_dimension_numbers<[1], [0], [0], [1], [0, 0, 1, 1], [], []>} : vector<2x96xf32>, vector<96x256xf32>, vector<2x256xf32> -> vector<2x256xf32>
    %390 = vector.broadcast %1 : vector<1x256xf32> to vector<2x256xf32>
    %391 = arith.addf %389, %390 : vector<2x256xf32>
    %392 = vector.extract_strided_slice %391 {offsets = [0, 0], sizes = [2, 128], strides = [1, 1]} : vector<2x256xf32> to vector<2x128xf32>
    %393 = vector.extract_strided_slice %392 {offsets = [0, 0], sizes = [2, 32], strides = [1, 1]} : vector<2x128xf32> to vector<2x32xf32>
    %394 = arith.negf %393 : vector<2x32xf32>
    %395 = math.exp %394 : vector<2x32xf32>
    %cst_80 = arith.constant 1.000000e+00 : f32
    %396 = vector.broadcast %cst_80 : f32 to vector<2x32xf32>
    %397 = arith.addf %396, %395 : vector<2x32xf32>
    %398 = arith.divf %396, %397 : vector<2x32xf32>
    %399 = vector.extract_strided_slice %392 {offsets = [0, 32], sizes = [2, 32], strides = [1, 1]} : vector<2x128xf32> to vector<2x32xf32>
    %400 = arith.negf %399 : vector<2x32xf32>
    %401 = math.exp %400 : vector<2x32xf32>
    %cst_81 = arith.constant 1.000000e+00 : f32
    %402 = vector.broadcast %cst_81 : f32 to vector<2x32xf32>
    %403 = arith.addf %402, %401 : vector<2x32xf32>
    %404 = arith.divf %402, %403 : vector<2x32xf32>
    %405 = vector.extract_strided_slice %392 {offsets = [0, 64], sizes = [2, 32], strides = [1, 1]} : vector<2x128xf32> to vector<2x32xf32>
    %406 = math.tanh %405 : vector<2x32xf32>
    %407 = vector.extract_strided_slice %392 {offsets = [0, 96], sizes = [2, 32], strides = [1, 1]} : vector<2x128xf32> to vector<2x32xf32>
    %408 = arith.negf %407 : vector<2x32xf32>
    %409 = math.exp %408 : vector<2x32xf32>
    %cst_82 = arith.constant 1.000000e+00 : f32
    %410 = vector.broadcast %cst_82 : f32 to vector<2x32xf32>
    %411 = arith.addf %410, %409 : vector<2x32xf32>
    %412 = arith.divf %410, %411 : vector<2x32xf32>
    %413 = arith.mulf %404, %352 : vector<2x32xf32>
    %414 = arith.mulf %398, %406 : vector<2x32xf32>
    %415 = arith.addf %413, %414 : vector<2x32xf32>
    %416 = math.tanh %415 : vector<2x32xf32>
    %417 = arith.mulf %412, %416 : vector<2x32xf32>
    %418 = vector.extract_strided_slice %391 {offsets = [0, 128], sizes = [2, 128], strides = [1, 1]} : vector<2x256xf32> to vector<2x128xf32>
    %419 = vector.extract_strided_slice %418 {offsets = [0, 0], sizes = [2, 32], strides = [1, 1]} : vector<2x128xf32> to vector<2x32xf32>
    %420 = arith.negf %419 : vector<2x32xf32>
    %421 = math.exp %420 : vector<2x32xf32>
    %cst_83 = arith.constant 1.000000e+00 : f32
    %422 = vector.broadcast %cst_83 : f32 to vector<2x32xf32>
    %423 = arith.addf %422, %421 : vector<2x32xf32>
    %424 = arith.divf %422, %423 : vector<2x32xf32>
    %425 = vector.extract_strided_slice %418 {offsets = [0, 32], sizes = [2, 32], strides = [1, 1]} : vector<2x128xf32> to vector<2x32xf32>
    %426 = arith.negf %425 : vector<2x32xf32>
    %427 = math.exp %426 : vector<2x32xf32>
    %cst_84 = arith.constant 1.000000e+00 : f32
    %428 = vector.broadcast %cst_84 : f32 to vector<2x32xf32>
    %429 = arith.addf %428, %427 : vector<2x32xf32>
    %430 = arith.divf %428, %429 : vector<2x32xf32>
    %431 = vector.extract_strided_slice %418 {offsets = [0, 64], sizes = [2, 32], strides = [1, 1]} : vector<2x128xf32> to vector<2x32xf32>
    %432 = math.tanh %431 : vector<2x32xf32>
    %433 = vector.extract_strided_slice %418 {offsets = [0, 96], sizes = [2, 32], strides = [1, 1]} : vector<2x128xf32> to vector<2x32xf32>
    %434 = arith.negf %433 : vector<2x32xf32>
    %435 = math.exp %434 : vector<2x32xf32>
    %cst_85 = arith.constant 1.000000e+00 : f32
    %436 = vector.broadcast %cst_85 : f32 to vector<2x32xf32>
    %437 = arith.addf %436, %435 : vector<2x32xf32>
    %438 = arith.divf %436, %437 : vector<2x32xf32>
    %439 = arith.mulf %430, %378 : vector<2x32xf32>
    %440 = arith.mulf %424, %432 : vector<2x32xf32>
    %441 = arith.addf %439, %440 : vector<2x32xf32>
    %442 = math.tanh %441 : vector<2x32xf32>
    %443 = arith.mulf %438, %442 : vector<2x32xf32>
    %c7_i32_86 = arith.constant 7 : i32
    %444 = arith.index_cast %c7_i32_86 : i32 to index
    %c0_87 = arith.constant 0 : index
    %c0_88 = arith.constant 0 : index
    %445 = vector.load %arg0[%444, %c0_87, %c0_88] : memref<8x2x16xf32, #tpu.memory_space<vmem>>, vector<1x2x16xf32>
    %446 = vector.shape_cast %445 : vector<1x2x16xf32> to vector<2x16xf32>
    %c7_i32_89 = arith.constant 7 : i32
    %447 = arith.subi %c7_i32_89, %c7_i32_86 : i32
    %448 = arith.index_cast %447 : i32 to index
    %c0_90 = arith.constant 0 : index
    %c0_91 = arith.constant 0 : index
    %449 = vector.load %arg0[%448, %c0_90, %c0_91] : memref<8x2x16xf32, #tpu.memory_space<vmem>>, vector<1x2x16xf32>
    %450 = vector.shape_cast %449 : vector<1x2x16xf32> to vector<2x16xf32>
    %451 = tpu.concatenate %446, %417, %450, %443 in 1 : vector<2x16xf32>, vector<2x32xf32>, vector<2x16xf32>, vector<2x32xf32> -> vector<2x96xf32>
    %cst_92 = arith.constant dense<0.000000e+00> : vector<2x256xf32>
    %452 = tpu.matmul %451, %0, %cst_92 {dimension_numbers = #tpu.dot_dimension_numbers<[1], [0], [0], [1], [0, 0, 1, 1], [], []>} : vector<2x96xf32>, vector<96x256xf32>, vector<2x256xf32> -> vector<2x256xf32>
    %453 = vector.broadcast %1 : vector<1x256xf32> to vector<2x256xf32>
    %454 = arith.addf %452, %453 : vector<2x256xf32>
    %455 = vector.extract_strided_slice %454 {offsets = [0, 0], sizes = [2, 128], strides = [1, 1]} : vector<2x256xf32> to vector<2x128xf32>
    %456 = vector.extract_strided_slice %455 {offsets = [0, 0], sizes = [2, 32], strides = [1, 1]} : vector<2x128xf32> to vector<2x32xf32>
    %457 = arith.negf %456 : vector<2x32xf32>
    %458 = math.exp %457 : vector<2x32xf32>
    %cst_93 = arith.constant 1.000000e+00 : f32
    %459 = vector.broadcast %cst_93 : f32 to vector<2x32xf32>
    %460 = arith.addf %459, %458 : vector<2x32xf32>
    %461 = arith.divf %459, %460 : vector<2x32xf32>
    %462 = vector.extract_strided_slice %455 {offsets = [0, 32], sizes = [2, 32], strides = [1, 1]} : vector<2x128xf32> to vector<2x32xf32>
    %463 = arith.negf %462 : vector<2x32xf32>
    %464 = math.exp %463 : vector<2x32xf32>
    %cst_94 = arith.constant 1.000000e+00 : f32
    %465 = vector.broadcast %cst_94 : f32 to vector<2x32xf32>
    %466 = arith.addf %465, %464 : vector<2x32xf32>
    %467 = arith.divf %465, %466 : vector<2x32xf32>
    %468 = vector.extract_strided_slice %455 {offsets = [0, 64], sizes = [2, 32], strides = [1, 1]} : vector<2x128xf32> to vector<2x32xf32>
    %469 = math.tanh %468 : vector<2x32xf32>
    %470 = vector.extract_strided_slice %455 {offsets = [0, 96], sizes = [2, 32], strides = [1, 1]} : vector<2x128xf32> to vector<2x32xf32>
    %471 = arith.negf %470 : vector<2x32xf32>
    %472 = math.exp %471 : vector<2x32xf32>
    %cst_95 = arith.constant 1.000000e+00 : f32
    %473 = vector.broadcast %cst_95 : f32 to vector<2x32xf32>
    %474 = arith.addf %473, %472 : vector<2x32xf32>
    %475 = arith.divf %473, %474 : vector<2x32xf32>
    %476 = arith.mulf %467, %415 : vector<2x32xf32>
    %477 = arith.mulf %461, %469 : vector<2x32xf32>
    %478 = arith.addf %476, %477 : vector<2x32xf32>
    %479 = math.tanh %478 : vector<2x32xf32>
    %480 = arith.mulf %475, %479 : vector<2x32xf32>
    %481 = vector.extract_strided_slice %454 {offsets = [0, 128], sizes = [2, 128], strides = [1, 1]} : vector<2x256xf32> to vector<2x128xf32>
    %482 = vector.extract_strided_slice %481 {offsets = [0, 0], sizes = [2, 32], strides = [1, 1]} : vector<2x128xf32> to vector<2x32xf32>
    %483 = arith.negf %482 : vector<2x32xf32>
    %484 = math.exp %483 : vector<2x32xf32>
    %cst_96 = arith.constant 1.000000e+00 : f32
    %485 = vector.broadcast %cst_96 : f32 to vector<2x32xf32>
    %486 = arith.addf %485, %484 : vector<2x32xf32>
    %487 = arith.divf %485, %486 : vector<2x32xf32>
    %488 = vector.extract_strided_slice %481 {offsets = [0, 32], sizes = [2, 32], strides = [1, 1]} : vector<2x128xf32> to vector<2x32xf32>
    %489 = arith.negf %488 : vector<2x32xf32>
    %490 = math.exp %489 : vector<2x32xf32>
    %cst_97 = arith.constant 1.000000e+00 : f32
    %491 = vector.broadcast %cst_97 : f32 to vector<2x32xf32>
    %492 = arith.addf %491, %490 : vector<2x32xf32>
    %493 = arith.divf %491, %492 : vector<2x32xf32>
    %494 = vector.extract_strided_slice %481 {offsets = [0, 64], sizes = [2, 32], strides = [1, 1]} : vector<2x128xf32> to vector<2x32xf32>
    %495 = math.tanh %494 : vector<2x32xf32>
    %496 = vector.extract_strided_slice %481 {offsets = [0, 96], sizes = [2, 32], strides = [1, 1]} : vector<2x128xf32> to vector<2x32xf32>
    %497 = arith.negf %496 : vector<2x32xf32>
    %498 = math.exp %497 : vector<2x32xf32>
    %cst_98 = arith.constant 1.000000e+00 : f32
    %499 = vector.broadcast %cst_98 : f32 to vector<2x32xf32>
    %500 = arith.addf %499, %498 : vector<2x32xf32>
    %501 = arith.divf %499, %500 : vector<2x32xf32>
    %502 = arith.mulf %493, %441 : vector<2x32xf32>
    %503 = arith.mulf %487, %495 : vector<2x32xf32>
    %504 = arith.addf %502, %503 : vector<2x32xf32>
    %505 = math.tanh %504 : vector<2x32xf32>
    %506 = arith.mulf %501, %505 : vector<2x32xf32>
    %c8_i32 = arith.constant 8 : i32
    %507 = tpu.concatenate %480, %506 in 1 : vector<2x32xf32>, vector<2x32xf32> -> vector<2x64xf32>
    %c0_99 = arith.constant 0 : index
    %c0_100 = arith.constant 0 : index
    %508 = vector.load %arg3[%c0_99, %c0_100] : memref<64x16xf32, #tpu.memory_space<vmem>>, vector<64x16xf32>
    %cst_101 = arith.constant dense<0.000000e+00> : vector<2x16xf32>
    %509 = tpu.matmul %507, %508, %cst_101 {dimension_numbers = #tpu.dot_dimension_numbers<[1], [0], [0], [1], [0, 0, 1, 1], [], []>} : vector<2x64xf32>, vector<64x16xf32>, vector<2x16xf32> -> vector<2x16xf32>
    %c0_102 = arith.constant 0 : index
    %c0_103 = arith.constant 0 : index
    %510 = vector.load %arg4[%c0_102, %c0_103] : memref<1x16xf32, #tpu.memory_space<vmem>>, vector<1x16xf32>
    %511 = vector.broadcast %510 : vector<1x16xf32> to vector<2x16xf32>
    %512 = arith.addf %509, %511 : vector<2x16xf32>
    %513 = vector.extract_strided_slice %512 {offsets = [0, 0], sizes = [2, 8], strides = [1, 1]} : vector<2x16xf32> to vector<2x8xf32>
    %514 = vector.extract_strided_slice %512 {offsets = [0, 8], sizes = [2, 8], strides = [1, 1]} : vector<2x16xf32> to vector<2x8xf32>
    %cst_104 = arith.constant dense<0.000000e+00> : vector<2xf32>
    %515 = vector.multi_reduction <add>, %513, %cst_104 [1] : vector<2x8xf32> to vector<2xf32>
    %516 = vector.shape_cast %515 : vector<2xf32> to vector<2x1xf32>
    %cst_105 = arith.constant 8.000000e+00 : f32
    %517 = vector.broadcast %cst_105 : f32 to vector<2x1xf32>
    %518 = arith.divf %516, %517 : vector<2x1xf32>
    %519 = vector.broadcast %518 : vector<2x1xf32> to vector<2x8xf32>
    %520 = arith.subf %513, %519 : vector<2x8xf32>
    %521 = arith.mulf %520, %520 : vector<2x8xf32>
    %cst_106 = arith.constant dense<0.000000e+00> : vector<2xf32>
    %522 = vector.multi_reduction <add>, %521, %cst_106 [1] : vector<2x8xf32> to vector<2xf32>
    %523 = vector.shape_cast %522 : vector<2xf32> to vector<2x1xf32>
    %cst_107 = arith.constant 8.000000e+00 : f32
    %524 = vector.broadcast %cst_107 : f32 to vector<2x1xf32>
    %525 = arith.divf %523, %524 : vector<2x1xf32>
    %526 = vector.broadcast %518 : vector<2x1xf32> to vector<2x8xf32>
    %527 = arith.subf %513, %526 : vector<2x8xf32>
    %cst_108 = arith.constant 9.99999974E-6 : f32
    %528 = vector.broadcast %cst_108 : f32 to vector<2x1xf32>
    %529 = arith.addf %525, %528 : vector<2x1xf32>
    %530 = math.rsqrt %529 : vector<2x1xf32>
    %531 = vector.broadcast %530 : vector<2x1xf32> to vector<2x8xf32>
    %532 = arith.mulf %527, %531 : vector<2x8xf32>
    %cst_109 = arith.constant 0.000000e+00 : f32
    %533 = vector.broadcast %cst_109 : f32 to vector<2x8xf32>
    %534 = arith.maximumf %514, %533 : vector<2x8xf32>
    %535 = vector.broadcast %cst_109 : f32 to vector<2x8xf32>
    %536 = arith.subf %514, %535 : vector<2x8xf32>
    %537 = arith.cmpf one, %536, %536 : vector<2x8xf32>
    %538 = vector.broadcast %cst_109 : f32 to vector<2x8xf32>
    %539 = arith.addf %514, %538 : vector<2x8xf32>
    %540 = math.absf %536 : vector<2x8xf32>
    %cst_110 = arith.constant 0.000000e+00 : f32
    %541 = vector.broadcast %cst_110 : f32 to vector<2x8xf32>
    %542 = arith.subf %541, %540 : vector<2x8xf32>
    %543 = math.exp %542 : vector<2x8xf32>
    %544 = math.log1p %543 : vector<2x8xf32>
    %545 = arith.addf %534, %544 : vector<2x8xf32>
    %546 = arith.select %537, %539, %545 : vector<2x8xi1>, vector<2x8xf32>
    %c0_111 = arith.constant 0 : index
    %c0_112 = arith.constant 0 : index
    %547 = vector.load %arg5[%c0_111, %c0_112] : memref<2x8xf32, #tpu.memory_space<vmem>>, vector<2x8xf32>
    %548 = arith.mulf %547, %546 : vector<2x8xf32>
    %549 = arith.addf %532, %548 : vector<2x8xf32>
    %550 = tpu.concatenate %549, %532, %546 in 1 : vector<2x8xf32>, vector<2x8xf32>, vector<2x8xf32> -> vector<2x24xf32>
    %c0_113 = arith.constant 0 : index
    %c0_114 = arith.constant 0 : index
    %551 = vector.load %arg6[%c0_113, %c0_114] : memref<2x24xf32, #tpu.memory_space<vmem>>, vector<2x24xf32>
    tpu.vector_store %arg6[%c0_113, %c0_114], %550 {strides = array<i32>} : memref<2x24xf32, #tpu.memory_space<vmem>>, vector<2x24xf32>,
    return
  }
}

</mosaic_0001>

<bundles_post_ra>
// kernel: encoder_forward.1
= control target key start
LH: loop header
LB: loop body
LE: loop exit
PB: predicated region body
PF: predicated region fallthrough
CT: control target
= control target key end

     0   :  { %v1729_v3 = vmov 0.0   ;;  %s1730_s27 = smov 48   ;;  %vm55_vm0 = vcmask 130048   ;;  %vm57_vm1 = vcmask 392192   ;;  %vm59_vm2 = vcmask 523264   ;;  %s1731_s29 = smov 64   ;;  %s2229_s0 = inlined_call_operand.vmem [shape: f32[8,2,16], index: 0, kind: input, shape index: {}]   ;;  %s2230_s1 = inlined_call_operand.vmem [shape: f32[96,256], index: 1, kind: input, shape index: {}]   ;;  %s2231_s2 = inlined_call_operand.vmem [shape: f32[1,256], index: 2, kind: input, shape index: {}]   ;;  %s2232_s3 = inlined_call_operand.vmem [shape: f32[64,16], index: 3, kind: input, shape index: {}]   ;;  %s2233_s4 = inlined_call_operand.vmem [shape: f32[1,16], index: 4, kind: input, shape index: {}]   ;;  %s2234_s5 = inlined_call_operand.vmem [shape: f32[2,8], index: 5, kind: input, shape index: {}]   ;;  %s2235_s6 = inlined_call_operand.vmem [shape: f32[2,24], index: 6, kind: output, shape index: {}]  }
   0x1   :  { %v1320_v0 = vld [vmem:[%s2229_s0 + $0xe] sm:$0x3]  ;;  %v26_v2 = vld [vmem:[%s2230_s1 + $0x18] sm:$0xff]  ;;  %140 = vmatprep.mubr.f32.mxu0 %v1729_v3  ;;  %281 = vmatprep.mubr.f32.mxu1 %v1729_v3  ;;  %v23_v5 = vld [vmem:[%s2230_s1] sm:$0xff]  ;;  %vm72_vm3 = vcmask 785408   ;;  %v62_v43 = vlaneseq  ;;  %s1733_s8 = smov 96  }
   0x2   :  { %v24_v1 = vld [vmem:[%s2230_s1 + $0x8] sm:$0xff]  ;;  %52 = vrot.lane.b32.xlu0 %v1320_v0, %s1730_s27  ;;  %v25_v6 = vld [vmem:[%s2230_s1 + $0x10] sm:$0xff]  ;;  %v30_v9 = vld [vmem:[%s2230_s1 + $0x38] sm:$0xff]  ;;  %vm1735_vm4 = vmmov 0   ;;  %vm1174_vm5 = vcmask 261120   ;;  %vm1264_vm6 = vcmask 58368  }
   0x3   :  { %v1785_v4 = vpack.c.bf16 %v26_v2, %v24_v1  ;;  %v28_v7 = vld [vmem:[%s2230_s1 + $0x28] sm:$0xff]  ;;  %v1796_v8 = vpack.c.bf16 %v25_v6, %v23_v5  ;;  %v27_v10 = vld [vmem:[%s2230_s1 + $0x20] sm:$0xff]  ;;  %v29_v11 = vld [vmem:[%s2230_s1 + $0x30] sm:$0xff]  ;;  %v63_v44 = vshrl.u32 %v62_v43, 7  ;;  %vm1311_vm9 = vcmask 64512  }
   0x4   :  { %v1808_v12 = vpack.c.bf16 %v30_v9, %v28_v7  ;;  %v32_v13 = vld [vmem:[%s2230_s1 + $0x48] sm:$0xff]  ;;  %v34_v14 = vld [vmem:[%s2230_s1 + $0x58] sm:$0xff]  ;;  %v1818_v15 = vpack.c.bf16 %v29_v11, %v27_v10  ;;  %v31_v17 = vld [vmem:[%s2230_s1 + $0x40] sm:$0xff]  ;;  %vm1314_vm10 = vcmask 189440  }
   0x5   :  { %1382 = vmatprep.subr.bf16.mxu0 %v1785_v4  ;;  %1406 = vmatprep.subr.bf16.mxu1 %v1785_v4  ;;  %v1822_v16 = vpack.c.bf16 %v34_v14, %v32_v13  ;;  %v33_v18 = vld [vmem:[%s2230_s1 + $0x50] sm:$0xff]  ;;  %v36_v19 = vld [vmem:[%s2230_s1 + $0x68] sm:$0xff]  ;;  %v38_v20 = vld [vmem:[%s2230_s1 + $0x78] sm:$0xff]  ;;  %v64_v45 = vsub.s32 0, %v63_v44  ;;  %v68_v47 = vsub.s32 1, %v63_v44 }
   0x6   :  { %1384 = vmatpush1.bf16.msra.mxu0 %v1796_v8  ;;  %1408 = vmatpush1.bf16.msra.mxu1 %v1796_v8  ;;  %v1838_v21 = vpack.c.bf16 %v33_v18, %v31_v17  ;;  %v1842_v22 = vpack.c.bf16 %v38_v20, %v36_v19  ;;  %v35_v23 = vld [vmem:[%s2230_s1 + $0x60] sm:$0xff]  ;;  %v37_v24 = vld [vmem:[%s2230_s1 + $0x70] sm:$0xff]  ;;  %v40_v25 = vld [vmem:[%s2230_s1 + $0x88] sm:$0xff] }
   0x7   :  { %1386 = vmatprep.subr.bf16.mxu0 %v1808_v12  ;;  %1410 = vmatprep.subr.bf16.mxu1 %v1808_v12  ;;  %v42_v26 = vld [vmem:[%s2230_s1 + $0x98] sm:$0xff]  ;;  %v1858_v27 = vpack.c.bf16 %v37_v24, %v35_v23  ;;  %v39_v29 = vld [vmem:[%s2230_s1 + $0x80] sm:$0xff]  ;;  %v41_v30 = vld [vmem:[%s2230_s1 + $0x90] sm:$0xff] }
   0x8   :  { %v1862_v28 = vpack.c.bf16 %v42_v26, %v40_v25  ;;  %v44_v31 = vld [vmem:[%s2230_s1 + $0xa8] sm:$0xff]  ;;  %v46_v32 = vld [vmem:[%s2230_s1 + $0xb8] sm:$0xff]  ;;  %v1878_v33 = vpack.c.bf16 %v41_v30, %v39_v29  ;;  %v43_v35 = vld [vmem:[%s2230_s1 + $0xa0] sm:$0xff] }
   0x9   :  { %v1882_v34 = vpack.c.bf16 %v46_v32, %v44_v31  ;;  %v45_v36 = vld [vmem:[%s2230_s1 + $0xb0] sm:$0xff]  ;;  %v1904_v38 = vld [vmem:[%s2229_s0] sm:$0x3]  ;;  %v1948_v18 = vld [vmem:[%s2229_s0 + $0xc] sm:$0x3] }
   0xa   :  { %1388 = vmatpush1.bf16.msra.mxu0 %v1818_v15  ;;  %1412 = vmatpush1.bf16.msra.mxu1 %v1818_v15  ;;  %v1892_v37 = vpack.c.bf16 %v45_v36, %v43_v35  ;;  %v56_v39 = vsel %vm55_vm0, %v1904_v38, 0.0  ;;  %v47_v46 = vld [vmem:[%s2231_s2] sm:$0x3]  ;;  %s1732_s2 = smov 32   ;;  %v1957_v25 = vld [vmem:[%s2229_s0 + $0x2] sm:$0x3] }
   0xb   :  { %1390 = vmatprep.subr.bf16.mxu0 %v1822_v16  ;;  %1414 = vmatprep.subr.bf16.mxu1 %v1822_v16  ;;  %v1927_v48 = vrot.slane %v47_v46, %v64_v45  ;;  %v1929_v49 = vrot.slane %v47_v46, %v68_v47 }
   0xe   :  { %1392 = vmatpush1.bf16.msra.mxu0 %v1838_v21  ;;  %1416 = vmatpush1.bf16.msra.mxu1 %v1838_v21 }
   0xf   :  { %1394 = vmatprep.subr.bf16.mxu0 %v1842_v22  ;;  %1418 = vmatprep.subr.bf16.mxu1 %v1842_v22 }
  0x12   :  { %1396 = vmatpush1.bf16.msra.mxu0 %v1858_v27  ;;  %1420 = vmatpush1.bf16.msra.mxu1 %v1858_v27 }
  0x13   :  { %1398 = vmatprep.subr.bf16.mxu0 %v1862_v28  ;;  %1422 = vmatprep.subr.bf16.mxu1 %v1862_v28 }
  0x16   :  { %1400 = vmatpush1.bf16.msra.mxu0 %v1878_v33  ;;  %1424 = vmatpush1.bf16.msra.mxu1 %v1878_v33 }
  0x17   :  { %1402 = vmatprep.subr.bf16.mxu0 %v1882_v34  ;;  %1426 = vmatprep.subr.bf16.mxu1 %v1882_v34 }
  0x1a   :  { %1404 = vmatpush1.bf16.msra.mxu0 %v1892_v37  ;;  %1428 = vmatpush1.bf16.msra.mxu1 %v1892_v37 }
  0x1b   :  { %1430 = vmatprep.subr.bf16.mxu0 %v1785_v4  ;;  %1454 = vmatprep.subr.bf16.mxu1 %v1785_v4 }
  0x74   :  { %v53_v40 = vpop.permute.xlu0 %52 }
  0x75   :  { %v58_v41 = vsel %vm57_vm1, %v56_v39, %v53_v40 }
  0x76   :  { %v60_v42 = vsel %vm59_vm2, %v58_v41, 0.0 }
  0x77   :  { %1321 = vmatmul.mubr.msk.f32.vlgmr.msra.gmra.mrb[0].mxu0 %vm72_vm3, %v60_v42 }
  0x78   :  { %1432 = vmatpush1.bf16.msra.mxu0 %v1796_v8  ;;  %422 = vmatprep.mubr.f32.mxu0 %v1729_v3 }
  0x79   :  { %1434 = vmatprep.subr.bf16.mxu0 %v1808_v12 }
  0x7c   :  { %1436 = vmatpush1.bf16.msra.mxu0 %v1818_v15 }
  0x7d   :  { %1438 = vmatprep.subr.bf16.mxu0 %v1822_v16 }
  0x80   :  { %1440 = vmatpush1.bf16.msra.mxu0 %v1838_v21 }
  0x81   :  { %1442 = vmatprep.subr.bf16.mxu0 %v1842_v22 }
  0x84   :  { %1444 = vmatpush1.bf16.msra.mxu0 %v1858_v27 }
  0x85   :  { %1446 = vmatprep.subr.bf16.mxu0 %v1862_v28 }
  0x88   :  { %1448 = vmatpush1.bf16.msra.mxu0 %v1878_v33 }
  0x89   :  { %1450 = vmatprep.subr.bf16.mxu0 %v1882_v34 }
  0x8c   :  { %1452 = vmatpush1.bf16.msra.mxu0 %v1892_v37 }
  0x8d   :  { %1478 = vmatprep.subr.bf16.mxu0 %v1785_v4 }
 0x14a   :  { %v142_v50 = vpop.f32.mrb[0].mxu0 }
 0x14b   :  { %v143_v51 = vadd.f32 %v142_v50, %v1927_v48  ;;  %v144_v52 = vpop.f32.mrb[1].mxu0 }
 0x14c   :  { %v145_v53 = vadd.f32 %v144_v52, %v1929_v49 }
 0x14d   :  { %1594 = vtanh.f32 %v143_v51  ;;  %v1322_v56 = vmul.f32 -1.442695, %v143_v51 }
 0x14e   :  { %1596 = vtanh.f32 %v145_v53  ;;  %v1323_v57 = vmul.f32 -1.442695, %v145_v53 }
 0x14f   :  { %1598 = vpow2.f32 %v1322_v56 }
 0x150   :  { %1600 = vpow2.f32 %v1323_v57 }
 0x157   :  { %v1595_v54 = vpop.eup %1594 }
 0x158   :  { %v1597_v55 = vpop.eup %1596  ;;  %156 = vrot.lane.b32.xlu0 %v1595_v54, %s1731_s29 }
 0x159   :  { %180 = vrot.lane.b32.xlu1 %v1597_v55, %s1731_s29  ;;  %v1599_v58 = vpop.eup %1598 }
 0x15a   :  { %v1601_v59 = vpop.eup %1600  ;;  %v150_v60 = vadd.f32 1.0, %v1599_v58 }
 0x15b   :  { %v174_v61 = vadd.f32 1.0, %v1601_v59 }
 0x15c   :  { %1602 = vrcp.f32 %v150_v60 }
 0x15d   :  { %1604 = vrcp.f32 %v174_v61 }
 0x166   :  { %v1603_v62 = vpop.eup %1602 }
 0x167   :  { %v1605_v0 = vpop.eup %1604  ;;  %v154_v6 = vmul.f32 0.0, %v1603_v62 }
 0x168   :  { %v178_v9 = vmul.f32 0.0, %v1605_v0 }
 0x1ca   :  { %v157_v63 = vpop.permute.xlu0 %156 }
 0x1cb   :  { %v159_v1 = vmul.f32 %v1603_v62, %v157_v63  ;;  %v181_v2 = vpop.permute.xlu1 %180 }
 0x1cc   :  { %v183_v5 = vmul.f32 %v1605_v0, %v181_v2  ;;  %v1996_v2 = vld [vmem:[%s2229_s0 + $0xa] sm:$0x3] }
 0x1cd   :  { %161 = vrot.lane.b32.xlu1 %v159_v1, %s1732_s2 }
 0x1ce   :  { %185 = vrot.lane.b32.xlu0 %v183_v5, %s1732_s2 }
 0x23f   :  { %v162_v7 = vpop.permute.xlu1 %161 }
 0x240   :  { %v1937_v10 = vadd.f32 %v162_v7, %v154_v6  ;;  %v186_v11 = vpop.permute.xlu0 %185 }
 0x241   :  { %v1939_v13 = vadd.f32 %v186_v11, %v178_v9 }
 0x242   :  { %1606 = vtanh.f32 %v1937_v10 }
 0x243   :  { %1608 = vtanh.f32 %v1939_v13 }
 0x24c   :  { %v1607_v14 = vpop.eup %1606 }
 0x24d   :  { %v1609_v17 = vpop.eup %1608  ;;  %167 = vrot.lane.b32.xlu1 %v1607_v14, %s1731_s29 }
 0x24e   :  { %191 = vrot.lane.b32.xlu0 %v1609_v17, %s1731_s29 }
 0x252   :  { %204 = vrot.lane.b32.xlu0 %v1948_v18, %s1730_s27 }
 0x2bf   :  { %v168_v19 = vpop.permute.xlu1 %167 }
 0x2c0   :  { %v170_v20 = vmul.f32 %v1603_v62, %v168_v19  ;;  %v192_v23 = vpop.permute.xlu0 %191 }
 0x2c1   :  { %v194_v24 = vmul.f32 %v1605_v0, %v192_v23 }
 0x2c2   :  { %200 = vrot.lane.b32.xlu1 %v170_v20, %s1730_s27 }
 0x2c4   :  { %v205_v30 = vpop.permute.xlu0 %204 }
 0x2c6   :  { %208 = vrot.lane.b32.xlu1 %v194_v24, %s1733_s8 }
 0x334   :  { %v201_v26 = vpop.permute.xlu1 %200 }
 0x335   :  { %v211_v29 = vsel %vm55_vm0, %v1957_v25, %v201_v26 }
 0x336   :  { %v212_v31 = vsel %vm57_vm1, %v211_v29, %v205_v30 }
 0x338   :  { %v209_v32 = vpop.permute.xlu1 %208 }
 0x339   :  { %v213_v35 = vsel %vm59_vm2, %v212_v31, %v209_v32 }
 0x33a   :  { %1326 = vmatmul.mubr.msk.f32.vlgmr.msra.gmra.mrb[0].mxu1 %vm72_vm3, %v213_v35 }
 0x33b   :  { %1456 = vmatpush1.bf16.msra.mxu1 %v1796_v8  ;;  %563 = vmatprep.mubr.f32.mxu1 %v1729_v3 }
 0x33c   :  { %1458 = vmatprep.subr.bf16.mxu1 %v1808_v12 }
 0x33f   :  { %1460 = vmatpush1.bf16.msra.mxu1 %v1818_v15 }
 0x340   :  { %1462 = vmatprep.subr.bf16.mxu1 %v1822_v16 }
 0x343   :  { %1464 = vmatpush1.bf16.msra.mxu1 %v1838_v21 }
 0x344   :  { %1466 = vmatprep.subr.bf16.mxu1 %v1842_v22 }
 0x347   :  { %1468 = vmatpush1.bf16.msra.mxu1 %v1858_v27 }
 0x348   :  { %1470 = vmatprep.subr.bf16.mxu1 %v1862_v28 }
 0x34b   :  { %1472 = vmatpush1.bf16.msra.mxu1 %v1878_v33 }
 0x34c   :  { %1474 = vmatprep.subr.bf16.mxu1 %v1882_v34 }
 0x34f   :  { %1476 = vmatpush1.bf16.msra.mxu1 %v1892_v37 }
 0x350   :  { %1502 = vmatprep.subr.bf16.mxu1 %v1785_v4 }
 0x40d   :  { %v283_v36 = vpop.f32.mrb[0].mxu1 }
 0x40e   :  { %v284_v39 = vadd.f32 %v283_v36, %v1927_v48  ;;  %v285_v40 = vpop.f32.mrb[1].mxu1 }
 0x40f   :  { %v286_v41 = vadd.f32 %v285_v40, %v1929_v49 }
 0x410   :  { %1610 = vtanh.f32 %v284_v39  ;;  %v1327_v44 = vmul.f32 -1.442695, %v284_v39 }
 0x411   :  { %1612 = vtanh.f32 %v286_v41  ;;  %v1328_v45 = vmul.f32 -1.442695, %v286_v41 }
 0x412   :  { %1614 = vpow2.f32 %v1327_v44 }
 0x413   :  { %1616 = vpow2.f32 %v1328_v45 }
 0x41a   :  { %v1611_v42 = vpop.eup %1610 }
 0x41b   :  { %v1613_v43 = vpop.eup %1612  ;;  %297 = vrot.lane.b32.xlu0 %v1611_v42, %s1731_s29 }
 0x41c   :  { %321 = vrot.lane.b32.xlu1 %v1613_v43, %s1731_s29  ;;  %v1615_v46 = vpop.eup %1614 }
 0x41d   :  { %v1617_v47 = vpop.eup %1616  ;;  %v291_v50 = vadd.f32 1.0, %v1615_v46 }
 0x41e   :  { %v315_v51 = vadd.f32 1.0, %v1617_v47 }
 0x41f   :  { %1618 = vrcp.f32 %v291_v50 }
 0x420   :  { %1620 = vrcp.f32 %v315_v51 }
 0x429   :  { %v1619_v52 = vpop.eup %1618 }
 0x42a   :  { %v1621_v54 = vpop.eup %1620  ;;  %v295_v58 = vmul.f32 %v1619_v52, %v1937_v10  ;;  %v2005_v10 = vld [vmem:[%s2229_s0 + $0x4] sm:$0x3] }
 0x42b   :  { %v319_v60 = vmul.f32 %v1621_v54, %v1939_v13 }
 0x48d   :  { %v298_v53 = vpop.permute.xlu0 %297 }
 0x48e   :  { %v300_v55 = vmul.f32 %v1619_v52, %v298_v53  ;;  %v322_v56 = vpop.permute.xlu1 %321 }
 0x48f   :  { %v324_v57 = vmul.f32 %v1621_v54, %v322_v56 }
 0x490   :  { %302 = vrot.lane.b32.xlu0 %v300_v55, %s1732_s2 }
 0x491   :  { %326 = vrot.lane.b32.xlu1 %v324_v57, %s1732_s2 }
 0x502   :  { %v303_v59 = vpop.permute.xlu0 %302 }
 0x503   :  { %v1985_v61 = vadd.f32 %v303_v59, %v295_v58  ;;  %v327_v62 = vpop.permute.xlu1 %326  ;;  %v2044_v58 = vld [vmem:[%s2229_s0 + $0x8] sm:$0x3] }
 0x504   :  { %v1987_v63 = vadd.f32 %v327_v62, %v319_v60 }
 0x505   :  { %1622 = vtanh.f32 %v1985_v61 }
 0x506   :  { %1624 = vtanh.f32 %v1987_v63 }
 0x50f   :  { %v1623_v0 = vpop.eup %1622 }
 0x510   :  { %v1625_v1 = vpop.eup %1624  ;;  %308 = vrot.lane.b32.xlu0 %v1623_v0, %s1731_s29 }
 0x511   :  { %332 = vrot.lane.b32.xlu1 %v1625_v1, %s1731_s29 }
 0x515   :  { %345 = vrot.lane.b32.xlu1 %v1996_v2, %s1730_s27 }
 0x582   :  { %v309_v5 = vpop.permute.xlu0 %308 }
 0x583   :  { %v311_v6 = vmul.f32 %v1619_v52, %v309_v5  ;;  %v333_v7 = vpop.permute.xlu1 %332 }
 0x584   :  { %v335_v9 = vmul.f32 %v1621_v54, %v333_v7 }
 0x585   :  { %341 = vrot.lane.b32.xlu0 %v311_v6, %s1730_s27 }
 0x587   :  { %v346_v14 = vpop.permute.xlu1 %345 }
 0x589   :  { %349 = vrot.lane.b32.xlu0 %v335_v9, %s1733_s8 }
 0x5f7   :  { %v342_v11 = vpop.permute.xlu0 %341 }
 0x5f8   :  { %v352_v13 = vsel %vm55_vm0, %v2005_v10, %v342_v11 }
 0x5f9   :  { %v353_v17 = vsel %vm57_vm1, %v352_v13, %v346_v14 }
 0x5fb   :  { %v350_v19 = vpop.permute.xlu0 %349 }
 0x5fc   :  { %v354_v20 = vsel %vm59_vm2, %v353_v17, %v350_v19 }
 0x5fd   :  { %1331 = vmatmul.mubr.msk.f32.vlgmr.msra.gmra.mrb[2].mxu0 %vm72_vm3, %v354_v20 }
 0x5fe   :  { %1480 = vmatpush1.bf16.msra.mxu0 %v1796_v8  ;;  %700 = vmatprep.mubr.f32.mxu0 %v1729_v3 }
 0x5ff   :  { %1482 = vmatprep.subr.bf16.mxu0 %v1808_v12 }
 0x602   :  { %1484 = vmatpush1.bf16.msra.mxu0 %v1818_v15 }
 0x603   :  { %1486 = vmatprep.subr.bf16.mxu0 %v1822_v16 }
 0x606   :  { %1488 = vmatpush1.bf16.msra.mxu0 %v1838_v21 }
 0x607   :  { %1490 = vmatprep.subr.bf16.mxu0 %v1842_v22 }
 0x60a   :  { %1492 = vmatpush1.bf16.msra.mxu0 %v1858_v27 }
 0x60b   :  { %1494 = vmatprep.subr.bf16.mxu0 %v1862_v28 }
 0x60e   :  { %1496 = vmatpush1.bf16.msra.mxu0 %v1878_v33 }
 0x60f   :  { %1498 = vmatprep.subr.bf16.mxu0 %v1882_v34 }
 0x612   :  { %1500 = vmatpush1.bf16.msra.mxu0 %v1892_v37 }
 0x613   :  { %1526 = vmatprep.subr.bf16.mxu0 %v1785_v4 }
 0x6d0   :  { %v424_v23 = vpop.f32.mrb[2].mxu0 }
 0x6d1   :  { %v425_v24 = vadd.f32 %v424_v23, %v1927_v48  ;;  %v426_v26 = vpop.f32.mrb[3].mxu0 }
 0x6d2   :  { %v427_v29 = vadd.f32 %v426_v26, %v1929_v49 }
 0x6d3   :  { %1626 = vtanh.f32 %v425_v24  ;;  %v1332_v32 = vmul.f32 -1.442695, %v425_v24 }
 0x6d4   :  { %1628 = vtanh.f32 %v427_v29  ;;  %v1333_v35 = vmul.f32 -1.442695, %v427_v29 }
 0x6d5   :  { %1630 = vpow2.f32 %v1332_v32 }
 0x6d6   :  { %1632 = vpow2.f32 %v1333_v35 }
 0x6dd   :  { %v1627_v30 = vpop.eup %1626 }
 0x6de   :  { %v1629_v31 = vpop.eup %1628  ;;  %438 = vrot.lane.b32.xlu1 %v1627_v30, %s1731_s29 }
 0x6df   :  { %462 = vrot.lane.b32.xlu0 %v1629_v31, %s1731_s29  ;;  %v1631_v36 = vpop.eup %1630 }
 0x6e0   :  { %v1633_v39 = vpop.eup %1632  ;;  %v432_v40 = vadd.f32 1.0, %v1631_v36 }
 0x6e1   :  { %v456_v41 = vadd.f32 1.0, %v1633_v39 }
 0x6e2   :  { %1634 = vrcp.f32 %v432_v40 }
 0x6e3   :  { %1636 = vrcp.f32 %v456_v41 }
 0x6ec   :  { %v1635_v42 = vpop.eup %1634 }
 0x6ed   :  { %v1637_v44 = vpop.eup %1636  ;;  %v436_v50 = vmul.f32 %v1635_v42, %v1985_v61 }
 0x6ee   :  { %v460_v52 = vmul.f32 %v1637_v44, %v1987_v63  ;;  %v1334_v63 = vld [vmem:[%s2229_s0 + $0x6] sm:$0x3] }
 0x750   :  { %v439_v43 = vpop.permute.xlu1 %438 }
 0x751   :  { %v441_v45 = vmul.f32 %v1635_v42, %v439_v43  ;;  %v463_v46 = vpop.permute.xlu0 %462 }
 0x752   :  { %v465_v47 = vmul.f32 %v1637_v44, %v463_v46 }
 0x753   :  { %443 = vrot.lane.b32.xlu1 %v441_v45, %s1732_s2 }
 0x754   :  { %467 = vrot.lane.b32.xlu0 %v465_v47, %s1732_s2 }
 0x7c5   :  { %v444_v51 = vpop.permute.xlu1 %443 }
 0x7c6   :  { %v2033_v53 = vadd.f32 %v444_v51, %v436_v50  ;;  %v468_v54 = vpop.permute.xlu0 %467 }
 0x7c7   :  { %v2035_v55 = vadd.f32 %v468_v54, %v460_v52 }
 0x7c8   :  { %1638 = vtanh.f32 %v2033_v53 }
 0x7c9   :  { %1640 = vtanh.f32 %v2035_v55 }
 0x7d2   :  { %v1639_v56 = vpop.eup %1638 }
 0x7d3   :  { %v1641_v57 = vpop.eup %1640  ;;  %449 = vrot.lane.b32.xlu1 %v1639_v56, %s1731_s29 }
 0x7d4   :  { %473 = vrot.lane.b32.xlu0 %v1641_v57, %s1731_s29 }
 0x7d8   :  { %486 = vrot.lane.b32.xlu0 %v2044_v58, %s1730_s27 }
 0x845   :  { %v450_v59 = vpop.permute.xlu1 %449 }
 0x846   :  { %v452_v60 = vmul.f32 %v1635_v42, %v450_v59  ;;  %v474_v61 = vpop.permute.xlu0 %473 }
 0x847   :  { %v476_v62 = vmul.f32 %v1637_v44, %v474_v61 }
 0x848   :  { %482 = vrot.lane.b32.xlu1 %v452_v60, %s1730_s27 }
 0x84a   :  { %v487_v5 = vpop.permute.xlu0 %486 }
 0x84c   :  { %490 = vrot.lane.b32.xlu1 %v476_v62, %s1733_s8 }
 0x8ba   :  { %v483_v0 = vpop.permute.xlu1 %482 }
 0x8bb   :  { %v493_v1 = vsel %vm55_vm0, %v1334_v63, %v483_v0 }
 0x8bc   :  { %v494_v6 = vsel %vm57_vm1, %v493_v1, %v487_v5 }
 0x8be   :  { %v491_v7 = vpop.permute.xlu1 %490 }
 0x8bf   :  { %v495_v9 = vsel %vm59_vm2, %v494_v6, %v491_v7 }
 0x8c0   :  { %1336 = vmatmul.mubr.msk.f32.vlgmr.msra.gmra.mrb[2].mxu1 %vm72_vm3, %v495_v9 }
 0x8c1   :  { %1504 = vmatpush1.bf16.msra.mxu1 %v1796_v8  ;;  %837 = vmatprep.mubr.f32.mxu1 %v1729_v3 }
 0x8c2   :  { %1506 = vmatprep.subr.bf16.mxu1 %v1808_v12 }
 0x8c5   :  { %1508 = vmatpush1.bf16.msra.mxu1 %v1818_v15 }
 0x8c6   :  { %1510 = vmatprep.subr.bf16.mxu1 %v1822_v16 }
 0x8c9   :  { %1512 = vmatpush1.bf16.msra.mxu1 %v1838_v21 }
 0x8ca   :  { %1514 = vmatprep.subr.bf16.mxu1 %v1842_v22 }
 0x8cd   :  { %1516 = vmatpush1.bf16.msra.mxu1 %v1858_v27 }
 0x8ce   :  { %1518 = vmatprep.subr.bf16.mxu1 %v1862_v28 }
 0x8d1   :  { %1520 = vmatpush1.bf16.msra.mxu1 %v1878_v33 }
 0x8d2   :  { %1522 = vmatprep.subr.bf16.mxu1 %v1882_v34 }
 0x8d5   :  { %1524 = vmatpush1.bf16.msra.mxu1 %v1892_v37 }
 0x8d6   :  { %1550 = vmatprep.subr.bf16.mxu1 %v1785_v4 }
 0x993   :  { %v565_v11 = vpop.f32.mrb[2].mxu1 }
 0x994   :  { %v566_v13 = vadd.f32 %v565_v11, %v1927_v48  ;;  %v567_v14 = vpop.f32.mrb[3].mxu1 }
 0x995   :  { %v568_v17 = vadd.f32 %v567_v14, %v1929_v49 }
 0x996   :  { %1642 = vtanh.f32 %v566_v13  ;;  %v1337_v23 = vmul.f32 -1.442695, %v566_v13 }
 0x997   :  { %1644 = vtanh.f32 %v568_v17  ;;  %v1338_v24 = vmul.f32 -1.442695, %v568_v17 }
 0x998   :  { %1646 = vpow2.f32 %v1337_v23 }
 0x999   :  { %1648 = vpow2.f32 %v1338_v24 }
 0x9a0   :  { %v1643_v19 = vpop.eup %1642 }
 0x9a1   :  { %v1645_v20 = vpop.eup %1644  ;;  %579 = vrot.lane.b32.xlu0 %v1643_v19, %s1731_s29 }
 0x9a2   :  { %603 = vrot.lane.b32.xlu1 %v1645_v20, %s1731_s29  ;;  %v1647_v26 = vpop.eup %1646 }
 0x9a3   :  { %v1649_v4 = vpop.eup %1648  ;;  %v573_v29 = vadd.f32 1.0, %v1647_v26 }
 0x9a4   :  { %v597_v30 = vadd.f32 1.0, %v1649_v4 }
 0x9a5   :  { %1650 = vrcp.f32 %v573_v29 }
 0x9a6   :  { %1652 = vrcp.f32 %v597_v30 }
 0x9af   :  { %v1651_v31 = vpop.eup %1650 }
 0x9b0   :  { %v1653_v35 = vpop.eup %1652  ;;  %v577_v41 = vmul.f32 %v1651_v31, %v2033_v53 }
 0x9b1   :  { %v601_v43 = vmul.f32 %v1653_v35, %v2035_v55 }
 0xa13   :  { %v580_v32 = vpop.permute.xlu0 %579 }
 0xa14   :  { %v582_v36 = vmul.f32 %v1651_v31, %v580_v32  ;;  %v604_v39 = vpop.permute.xlu1 %603 }
 0xa15   :  { %v606_v40 = vmul.f32 %v1653_v35, %v604_v39 }
 0xa16   :  { %584 = vrot.lane.b32.xlu0 %v582_v36, %s1732_s2 }
 0xa17   :  { %608 = vrot.lane.b32.xlu1 %v606_v40, %s1732_s2 }
 0xa88   :  { %v585_v42 = vpop.permute.xlu0 %584 }
 0xa89   :  { %v2078_v44 = vadd.f32 %v585_v42, %v577_v41  ;;  %v609_v45 = vpop.permute.xlu1 %608 }
 0xa8a   :  { %v2080_v46 = vadd.f32 %v609_v45, %v601_v43 }
 0xa8b   :  { %1654 = vtanh.f32 %v2078_v44 }
 0xa8c   :  { %1656 = vtanh.f32 %v2080_v46 }
 0xa95   :  { %v1655_v47 = vpop.eup %1654 }
 0xa96   :  { %v1657_v50 = vpop.eup %1656  ;;  %590 = vrot.lane.b32.xlu0 %v1655_v47, %s1731_s29 }
 0xa97   :  { %614 = vrot.lane.b32.xlu1 %v1657_v50, %s1731_s29 }
 0xa9b   :  { %623 = vrot.lane.b32.xlu1 %v1334_v63, %s1730_s27 }
 0xb08   :  { %v591_v51 = vpop.permute.xlu0 %590 }
 0xb09   :  { %v593_v52 = vmul.f32 %v1651_v31, %v591_v51  ;;  %v615_v53 = vpop.permute.xlu1 %614 }
 0xb0a   :  { %v617_v54 = vmul.f32 %v1653_v35, %v615_v53 }
 0xb0b   :  { %619 = vrot.lane.b32.xlu0 %v593_v52, %s1730_s27 }
 0xb0d   :  { %v624_v57 = vpop.permute.xlu1 %623 }
 0xb0f   :  { %627 = vrot.lane.b32.xlu0 %v617_v54, %s1733_s8 }
 0xb7d   :  { %v620_v55 = vpop.permute.xlu0 %619 }
 0xb7e   :  { %v630_v56 = vsel %vm55_vm0, %v2044_v58, %v620_v55 }
 0xb7f   :  { %v631_v59 = vsel %vm57_vm1, %v630_v56, %v624_v57 }
 0xb81   :  { %v628_v60 = vpop.permute.xlu0 %627 }
 0xb82   :  { %v632_v61 = vsel %vm59_vm2, %v631_v59, %v628_v60 }
 0xb83   :  { %1339 = vmatmul.mubr.msk.f32.vlgmr.msra.gmra.mrb[4].mxu0 %vm72_vm3, %v632_v61 }
 0xb84   :  { %1528 = vmatpush1.bf16.msra.mxu0 %v1796_v8  ;;  %974 = vmatprep.mubr.f32.mxu0 %v1729_v3 }
 0xb85   :  { %1530 = vmatprep.subr.bf16.mxu0 %v1808_v12 }
 0xb88   :  { %1532 = vmatpush1.bf16.msra.mxu0 %v1818_v15 }
 0xb89   :  { %1534 = vmatprep.subr.bf16.mxu0 %v1822_v16 }
 0xb8c   :  { %1536 = vmatpush1.bf16.msra.mxu0 %v1838_v21 }
 0xb8d   :  { %1538 = vmatprep.subr.bf16.mxu0 %v1842_v22 }
 0xb90   :  { %1540 = vmatpush1.bf16.msra.mxu0 %v1858_v27 }
 0xb91   :  { %1542 = vmatprep.subr.bf16.mxu0 %v1862_v28 }
 0xb94   :  { %1544 = vmatpush1.bf16.msra.mxu0 %v1878_v33 }
 0xb95   :  { %1546 = vmatprep.subr.bf16.mxu0 %v1882_v34 }
 0xb98   :  { %1548 = vmatpush1.bf16.msra.mxu0 %v1892_v37 }
 0xc56   :  { %v702_v58 = vpop.f32.mrb[4].mxu0 }
 0xc57   :  { %v703_v62 = vadd.f32 %v702_v58, %v1927_v48  ;;  %v704_v63 = vpop.f32.mrb[5].mxu0 }
 0xc58   :  { %v705_v0 = vadd.f32 %v704_v63, %v1929_v49 }
 0xc59   :  { %1658 = vtanh.f32 %v703_v62  ;;  %v1340_v6 = vmul.f32 -1.442695, %v703_v62 }
 0xc5a   :  { %1660 = vtanh.f32 %v705_v0  ;;  %v1341_v7 = vmul.f32 -1.442695, %v705_v0 }
 0xc5b   :  { %1662 = vpow2.f32 %v1340_v6 }
 0xc5c   :  { %1664 = vpow2.f32 %v1341_v7 }
 0xc63   :  { %v1659_v1 = vpop.eup %1658 }
 0xc64   :  { %v1661_v5 = vpop.eup %1660  ;;  %716 = vrot.lane.b32.xlu1 %v1659_v1, %s1731_s29 }
 0xc65   :  { %740 = vrot.lane.b32.xlu0 %v1661_v5, %s1731_s29  ;;  %v1663_v9 = vpop.eup %1662 }
 0xc66   :  { %v1665_v11 = vpop.eup %1664  ;;  %v710_v13 = vadd.f32 1.0, %v1663_v9 }
 0xc67   :  { %v734_v14 = vadd.f32 1.0, %v1665_v11 }
 0xc68   :  { %1666 = vrcp.f32 %v710_v13 }
 0xc69   :  { %1668 = vrcp.f32 %v734_v14 }
 0xc72   :  { %v1667_v17 = vpop.eup %1666 }
 0xc73   :  { %v1669_v20 = vpop.eup %1668  ;;  %v714_v4 = vmul.f32 %v1667_v17, %v2078_v44 }
 0xc74   :  { %v738_v30 = vmul.f32 %v1669_v20, %v2080_v46 }
 0xcd6   :  { %v717_v19 = vpop.permute.xlu1 %716 }
 0xcd7   :  { %v719_v23 = vmul.f32 %v1667_v17, %v717_v19  ;;  %v741_v24 = vpop.permute.xlu0 %740 }
 0xcd8   :  { %v743_v26 = vmul.f32 %v1669_v20, %v741_v24 }
 0xcd9   :  { %721 = vrot.lane.b32.xlu1 %v719_v23, %s1732_s2 }
 0xcda   :  { %745 = vrot.lane.b32.xlu0 %v743_v26, %s1732_s2 }
 0xd4b   :  { %v722_v29 = vpop.permute.xlu1 %721 }
 0xd4c   :  { %v2114_v31 = vadd.f32 %v722_v29, %v714_v4  ;;  %v746_v32 = vpop.permute.xlu0 %745 }
 0xd4d   :  { %v2116_v35 = vadd.f32 %v746_v32, %v738_v30 }
 0xd4e   :  { %1670 = vtanh.f32 %v2114_v31 }
 0xd4f   :  { %1672 = vtanh.f32 %v2116_v35 }
 0xd58   :  { %v1671_v36 = vpop.eup %1670 }
 0xd59   :  { %v1673_v39 = vpop.eup %1672  ;;  %727 = vrot.lane.b32.xlu1 %v1671_v36, %s1731_s29 }
 0xd5a   :  { %751 = vrot.lane.b32.xlu0 %v1673_v39, %s1731_s29 }
 0xd5e   :  { %760 = vrot.lane.b32.xlu0 %v2005_v10, %s1730_s27 }
 0xdcb   :  { %v728_v40 = vpop.permute.xlu1 %727 }
 0xdcc   :  { %v730_v41 = vmul.f32 %v1667_v17, %v728_v40  ;;  %v752_v42 = vpop.permute.xlu0 %751 }
 0xdcd   :  { %v754_v43 = vmul.f32 %v1669_v20, %v752_v42 }
 0xdce   :  { %756 = vrot.lane.b32.xlu1 %v730_v41, %s1730_s27 }
 0xdd0   :  { %v761_v46 = vpop.permute.xlu0 %760 }
 0xdd2   :  { %764 = vrot.lane.b32.xlu1 %v754_v43, %s1733_s8 }
 0xe40   :  { %v757_v44 = vpop.permute.xlu1 %756 }
 0xe41   :  { %v767_v45 = vsel %vm55_vm0, %v1996_v2, %v757_v44 }
 0xe42   :  { %v768_v47 = vsel %vm57_vm1, %v767_v45, %v761_v46 }
 0xe44   :  { %v765_v50 = vpop.permute.xlu1 %764 }
 0xe45   :  { %v769_v51 = vsel %vm59_vm2, %v768_v47, %v765_v50 }
 0xe46   :  { %1342 = vmatmul.mubr.msk.f32.vlgmr.msra.gmra.mrb[4].mxu1 %vm72_vm3, %v769_v51 }
 0xe47   :  { %1552 = vmatpush1.bf16.msra.mxu1 %v1796_v8  ;;  %1111 = vmatprep.mubr.f32.mxu1 %v1729_v3 }
 0xe48   :  { %1554 = vmatprep.subr.bf16.mxu1 %v1808_v12 }
 0xe4b   :  { %1556 = vmatpush1.bf16.msra.mxu1 %v1818_v15 }
 0xe4c   :  { %1558 = vmatprep.subr.bf16.mxu1 %v1822_v16 }
 0xe4f   :  { %1560 = vmatpush1.bf16.msra.mxu1 %v1838_v21 }
 0xe50   :  { %1562 = vmatprep.subr.bf16.mxu1 %v1842_v22 }
 0xe53   :  { %1564 = vmatpush1.bf16.msra.mxu1 %v1858_v27 }
 0xe54   :  { %1566 = vmatprep.subr.bf16.mxu1 %v1862_v28 }
 0xe57   :  { %1568 = vmatpush1.bf16.msra.mxu1 %v1878_v33 }
 0xe58   :  { %1570 = vmatprep.subr.bf16.mxu1 %v1882_v34 }
 0xe5b   :  { %1572 = vmatpush1.bf16.msra.mxu1 %v1892_v37 }
 0xf19   :  { %v839_v8 = vpop.f32.mrb[4].mxu1 }
 0xf1a   :  { %v840_v12 = vadd.f32 %v839_v8, %v1927_v48  ;;  %v841_v15 = vpop.f32.mrb[5].mxu1 }
 0xf1b   :  { %v842_v16 = vadd.f32 %v841_v15, %v1929_v49 }
 0xf1c   :  { %1674 = vtanh.f32 %v840_v12  ;;  %v1343_v27 = vmul.f32 -1.442695, %v840_v12 }
 0xf1d   :  { %1676 = vtanh.f32 %v842_v16  ;;  %v1344_v28 = vmul.f32 -1.442695, %v842_v16 }
 0xf1e   :  { %1678 = vpow2.f32 %v1343_v27 }
 0xf1f   :  { %1680 = vpow2.f32 %v1344_v28  ;;  %v1728_v28 = vld [vmem:[%s2229_s0 + $0xe] sm:$0x3] }
 0xf26   :  { %v1675_v21 = vpop.eup %1674 }
 0xf27   :  { %v1677_v22 = vpop.eup %1676  ;;  %853 = vrot.lane.b32.xlu0 %v1675_v21, %s1731_s29 }
 0xf28   :  { %877 = vrot.lane.b32.xlu1 %v1677_v22, %s1731_s29  ;;  %v1679_v33 = vpop.eup %1678 }
 0xf29   :  { %v1681_v34 = vpop.eup %1680  ;;  %v847_v37 = vadd.f32 1.0, %v1679_v33 }
 0xf2a   :  { %v871_v2 = vadd.f32 1.0, %v1681_v34 }
 0xf2b   :  { %1682 = vrcp.f32 %v847_v37 }
 0xf2c   :  { %1684 = vrcp.f32 %v871_v2 }
 0xf35   :  { %v1683_v10 = vpop.eup %1682 }
 0xf36   :  { %v1685_v53 = vpop.eup %1684  ;;  %v851_v57 = vmul.f32 %v1683_v10, %v2114_v31 }
 0xf37   :  { %v875_v60 = vmul.f32 %v1685_v53, %v2116_v35 }
 0xf99   :  { %v854_v52 = vpop.permute.xlu0 %853 }
 0xf9a   :  { %v856_v54 = vmul.f32 %v1683_v10, %v854_v52  ;;  %v878_v55 = vpop.permute.xlu1 %877 }
 0xf9b   :  { %v880_v56 = vmul.f32 %v1685_v53, %v878_v55 }
 0xf9c   :  { %858 = vrot.lane.b32.xlu0 %v856_v54, %s1732_s2 }
 0xf9d   :  { %882 = vrot.lane.b32.xlu1 %v880_v56, %s1732_s2 }
0x100e   :  { %v859_v59 = vpop.permute.xlu0 %858 }
0x100f   :  { %v861_v61 = vadd.f32 %v859_v59, %v851_v57  ;;  %v883_v58 = vpop.permute.xlu1 %882 }
0x1010   :  { %v885_v62 = vadd.f32 %v883_v58, %v875_v60 }
0x1011   :  { %1686 = vtanh.f32 %v861_v61 }
0x1012   :  { %1688 = vtanh.f32 %v885_v62 }
0x101b   :  { %v1687_v63 = vpop.eup %1686 }
0x101c   :  { %v1689_v0 = vpop.eup %1688  ;;  %864 = vrot.lane.b32.xlu0 %v1687_v63, %s1731_s29 }
0x101d   :  { %888 = vrot.lane.b32.xlu1 %v1689_v0, %s1731_s29 }
0x1021   :  { %897 = vrot.lane.b32.xlu1 %v1957_v25, %s1730_s27 }
0x108e   :  { %v865_v1 = vpop.permute.xlu0 %864 }
0x108f   :  { %v867_v5 = vmul.f32 %v1683_v10, %v865_v1  ;;  %v889_v6 = vpop.permute.xlu1 %888 }
0x1090   :  { %v891_v7 = vmul.f32 %v1685_v53, %v889_v6 }
0x1091   :  { %893 = vrot.lane.b32.xlu0 %v867_v5, %s1730_s27 }
0x1093   :  { %v898_v13 = vpop.permute.xlu1 %897 }
0x1095   :  { %901 = vrot.lane.b32.xlu0 %v891_v7, %s1733_s8 }
0x1103   :  { %v894_v9 = vpop.permute.xlu0 %893 }
0x1104   :  { %v904_v11 = vsel %vm55_vm0, %v1948_v18, %v894_v9 }
0x1105   :  { %v905_v14 = vsel %vm57_vm1, %v904_v11, %v898_v13 }
0x1107   :  { %v902_v17 = vpop.permute.xlu0 %901 }
0x1108   :  { %v906_v19 = vsel %vm59_vm2, %v905_v14, %v902_v17  ;;  %v1734_v17 = vmov 0.0|0.0  }
0x1109   :  { %1345 = vmatmul.mubr.msk.f32.vlgmr.msra.gmra.mrb[6].mxu0 %vm72_vm3, %v906_v19  ;;  %1573 = vmatprep.subr.bf16.mxu0 %v1734_v17  ;;  %v1176_v19 = vld [vmem:[%s2232_s3] sm:$0xff] }
0x110a   :  { %1378 = vmatprep.mubr.msk.f32.mxu0 %vm1735_vm4, %v1729_v3 }
0x11dc   :  { %v976_v25 = vpop.f32.mrb[6].mxu0 }
0x11dd   :  { %v977_v20 = vadd.f32 %v976_v25, %v1927_v48  ;;  %v978_v23 = vpop.f32.mrb[7].mxu0  ;;  %v1177_v25 = vld [vmem:[%s2232_s3 + $0x8] sm:$0xff] }
0x11de   :  { %v979_v24 = vadd.f32 %v978_v23, %v1929_v49  ;;  %v1574_v23 = vpack.c.bf16 %v1177_v25, %v1176_v19 }
0x11df   :  { %1690 = vtanh.f32 %v977_v20  ;;  %v1346_v18 = vmul.f32 -1.442695, %v977_v20  ;;  %v1178_v20 = vld [vmem:[%s2232_s3 + $0x10] sm:$0xff] }
0x11e0   :  { %1692 = vtanh.f32 %v979_v24  ;;  %v1347_v29 = vmul.f32 -1.442695, %v979_v24  ;;  %v1179_v24 = vld [vmem:[%s2232_s3 + $0x18] sm:$0xff]  ;;  %1575 = vmatpush3.bf16.msra.mxu0 %v1574_v23 }
0x11e1   :  { %1694 = vpow2.f32 %v1346_v18  ;;  %1576 = vmatprep.subr.bf16.mxu0 %v1734_v17  ;;  %v1181_v18 = vld [vmem:[%s2232_s3 + $0x28] sm:$0xff] }
0x11e2   :  { %1696 = vpow2.f32 %v1347_v29 }
0x11e9   :  { %v1691_v26 = vpop.eup %1690 }
0x11ea   :  { %v1693_v4 = vpop.eup %1692  ;;  %990 = vrot.lane.b32.xlu1 %v1691_v26, %s1731_s29  ;;  %v1577_v26 = vpack.c.bf16 %v1179_v24, %v1178_v20 }
0x11eb   :  { %1014 = vrot.lane.b32.xlu0 %v1693_v4, %s1731_s29  ;;  %v1695_v30 = vpop.eup %1694  ;;  %v1180_v4 = vld [vmem:[%s2232_s3 + $0x20] sm:$0xff] }
0x11ec   :  { %v1697_v31 = vpop.eup %1696  ;;  %v984_v32 = vadd.f32 1.0, %v1695_v30  ;;  %1578 = vmatpush3.bf16.msra.mxu0 %v1577_v26  ;;  %v1580_v29 = vpack.c.bf16 %v1181_v18, %v1180_v4 }
0x11ed   :  { %v1008_v35 = vadd.f32 1.0, %v1697_v31  ;;  %1579 = vmatprep.subr.bf16.mxu0 %v1734_v17  ;;  %v1182_v31 = vld [vmem:[%s2232_s3 + $0x30] sm:$0xff] }
0x11ee   :  { %1698 = vrcp.f32 %v984_v32  ;;  %v1183_v32 = vld [vmem:[%s2232_s3 + $0x38] sm:$0xff] }
0x11ef   :  { %1700 = vrcp.f32 %v1008_v35 }
0x11f0   :  { %1581 = vmatpush3.bf16.msra.mxu0 %v1580_v29 }
0x11f1   :  { %1582 = vmatprep.subr.bf16.mxu0 %v1734_v17 }
0x11f8   :  { %v1699_v36 = vpop.eup %1698 }
0x11f9   :  { %v1701_v40 = vpop.eup %1700  ;;  %v988_v44 = vmul.f32 %v1699_v36, %v861_v61 }
0x11fa   :  { %v1012_v46 = vmul.f32 %v1701_v40, %v885_v62 }
0x125c   :  { %v991_v39 = vpop.permute.xlu1 %990 }
0x125d   :  { %v993_v41 = vmul.f32 %v1699_v36, %v991_v39  ;;  %v1015_v42 = vpop.permute.xlu0 %1014 }
0x125e   :  { %v1017_v43 = vmul.f32 %v1701_v40, %v1015_v42 }
0x125f   :  { %995 = vrot.lane.b32.xlu1 %v993_v41, %s1732_s2 }
0x1260   :  { %1019 = vrot.lane.b32.xlu0 %v1017_v43, %s1732_s2 }
0x12d1   :  { %v996_v45 = vpop.permute.xlu1 %995 }
0x12d2   :  { %v998_v47 = vadd.f32 %v996_v45, %v988_v44  ;;  %v1020_v50 = vpop.permute.xlu0 %1019 }
0x12d3   :  { %v1022_v51 = vadd.f32 %v1020_v50, %v1012_v46  ;;  %v1351_v46 = vld [vmem:[%s2233_s4] ss:$0 sm:$0xff]  ;;  %s1736_s4 = smov 120  }
0x12d4   :  { %1702 = vtanh.f32 %v998_v47 }
0x12d5   :  { %1704 = vtanh.f32 %v1022_v51 }
0x12de   :  { %v1703_v8 = vpop.eup %1702 }
0x12df   :  { %v1705_v12 = vpop.eup %1704  ;;  %1001 = vrot.lane.b32.xlu1 %v1703_v8, %s1731_s29 }
0x12e0   :  { %1025 = vrot.lane.b32.xlu0 %v1705_v12, %s1731_s29 }
0x12e4   :  { %1034 = vrot.lane.b32.xlu0 %v1904_v38, %s1730_s27 }
0x1351   :  { %v1002_v15 = vpop.permute.xlu1 %1001 }
0x1352   :  { %v1004_v16 = vmul.f32 %v1699_v36, %v1002_v15  ;;  %v1026_v21 = vpop.permute.xlu0 %1025  ;;  %v1583_v36 = vpack.c.bf16 %v1183_v32, %v1182_v31 }
0x1353   :  { %v1028_v22 = vmul.f32 %v1701_v40, %v1026_v21 }
0x1354   :  { %1030 = vrot.lane.b32.xlu1 %v1004_v16, %s1730_s27  ;;  %1584 = vmatpush3.bf16.msra.mxu0 %v1583_v36 }
0x1356   :  { %v1035_v34 = vpop.permute.xlu0 %1034 }
0x1358   :  { %1038 = vrot.lane.b32.xlu1 %v1028_v22, %s1733_s8 }
0x13c6   :  { %v1031_v27 = vpop.permute.xlu1 %1030 }
0x13c7   :  { %v1041_v33 = vsel %vm55_vm0, %v1728_v28, %v1031_v27 }
0x13c8   :  { %v1042_v37 = vsel %vm57_vm1, %v1041_v33, %v1035_v34 }
0x13ca   :  { %v1039_v2 = vpop.permute.xlu1 %1038 }
0x13cb   :  { %v1043_v38 = vsel %vm59_vm2, %v1042_v37, %v1039_v2 }
0x13cc   :  { %1348 = vmatmul.mubr.msk.f32.vlgmr.msra.gmra.mrb[6].mxu1 %vm72_vm3, %v1043_v38 }
0x149f   :  { %v1113_v10 = vpop.f32.mrb[6].mxu1 }
0x14a0   :  { %v1114_v52 = vadd.f32 %v1113_v10, %v1927_v48  ;;  %v1115_v53 = vpop.f32.mrb[7].mxu1 }
0x14a1   :  { %v1116_v54 = vadd.f32 %v1115_v53, %v1929_v49 }
0x14a2   :  { %1706 = vtanh.f32 %v1114_v52  ;;  %v1349_v57 = vmul.f32 -1.442695, %v1114_v52 }
0x14a3   :  { %1708 = vtanh.f32 %v1116_v54  ;;  %v1350_v59 = vmul.f32 -1.442695, %v1116_v54 }
0x14a4   :  { %1710 = vpow2.f32 %v1349_v57 }
0x14a5   :  { %1712 = vpow2.f32 %v1350_v59 }
0x14ac   :  { %v1707_v55 = vpop.eup %1706 }
0x14ad   :  { %v1709_v56 = vpop.eup %1708  ;;  %1127 = vrot.lane.b32.xlu0 %v1707_v55, %s1731_s29 }
0x14ae   :  { %1151 = vrot.lane.b32.xlu1 %v1709_v56, %s1731_s29  ;;  %v1711_v60 = vpop.eup %1710 }
0x14af   :  { %v1713_v61 = vpop.eup %1712  ;;  %v1121_v58 = vadd.f32 1.0, %v1711_v60 }
0x14b0   :  { %v1145_v62 = vadd.f32 1.0, %v1713_v61 }
0x14b1   :  { %1714 = vrcp.f32 %v1121_v58 }
0x14b2   :  { %1716 = vrcp.f32 %v1145_v62 }
0x14bb   :  { %v1715_v48 = vpop.eup %1714 }
0x14bc   :  { %v1717_v63 = vpop.eup %1716  ;;  %v1125_v6 = vmul.f32 %v1715_v48, %v998_v47 }
0x14bd   :  { %v1149_v9 = vmul.f32 %v1717_v63, %v1022_v51 }
0x151f   :  { %v1128_v49 = vpop.permute.xlu0 %1127 }
0x1520   :  { %v1130_v0 = vmul.f32 %v1715_v48, %v1128_v49  ;;  %v1152_v1 = vpop.permute.xlu1 %1151 }
0x1521   :  { %v1154_v5 = vmul.f32 %v1717_v63, %v1152_v1 }
0x1522   :  { %1132 = vrot.lane.b32.xlu0 %v1130_v0, %s1732_s2 }
0x1523   :  { %1156 = vrot.lane.b32.xlu1 %v1154_v5, %s1732_s2 }
0x1594   :  { %v1133_v7 = vpop.permute.xlu0 %1132 }
0x1595   :  { %v1135_v11 = vadd.f32 %v1133_v7, %v1125_v6  ;;  %v1157_v13 = vpop.permute.xlu1 %1156 }
0x1596   :  { %v1159_v14 = vadd.f32 %v1157_v13, %v1149_v9 }
0x1597   :  { %1718 = vtanh.f32 %v1135_v11 }
0x1598   :  { %1720 = vtanh.f32 %v1159_v14 }
0x15a1   :  { %v1719_v30 = vpop.eup %1718 }
0x15a2   :  { %v1721_v35 = vpop.eup %1720  ;;  %1138 = vrot.lane.b32.xlu0 %v1719_v30, %s1731_s29 }
0x15a3   :  { %1162 = vrot.lane.b32.xlu1 %v1721_v35, %s1731_s29 }
0x1614   :  { %v1139_v39 = vpop.permute.xlu0 %1138 }
0x1615   :  { %v1141_v40 = vmul.f32 %v1715_v48, %v1139_v39  ;;  %v1163_v41 = vpop.permute.xlu1 %1162  ;;  %v1297_v48 = vld [vmem:[%s2234_s5] sm:$0x3] }
0x1616   :  { %v1165_v42 = vmul.f32 %v1717_v63, %v1163_v41 }
0x1617   :  { %1167 = vrot.lane.b32.xlu0 %v1141_v40, %s1732_s2 }
0x1618   :  { %1171 = vrot.lane.b32.xlu1 %v1165_v42, %s1731_s29  ;;  %s1737_s29 = smov 8  }
0x1689   :  { %v1168_v43 = vpop.permute.xlu0 %1167 }
0x168a   :  { %v1172_v44 = vpop.permute.xlu1 %1171 }
0x168b   :  { %v1175_v45 = vsel %vm1174_vm5, %v1168_v43, %v1172_v44 }
0x168c   :  { %1379 = vmatmul.mubr.msk.f32.vlgmr.msra.gmra.mrb[8].mxu0 %vm59_vm2, %v1175_v45 }
0x175f   :  { %v1260_v47 = vpop.f32.mrb[8].mxu0 }
0x1760   :  { %v1261_v3 = vadd.f32 %v1351_v46, %v1260_v47  ;;  %v1380_v50 = vpop.f32.mrb[9].mxu0 }
0x1762   :  { %v1282_v51 = vand.u32 2147483647, %v1261_v3  ;;  %v1265_v8 = vsel %vm1264_vm6, %v1261_v3, 0.0  ;;  %v1279_v2 = vmax.f32 %v1261_v3, 0.0  ;;  %vm1280_vm8 = vcmp.ne.f32.partialorder %v1261_v3, %v1261_v3 }
0x1763   :  { %1266 = vadd.xlane.f32.xlu0 %v1265_v8 }
0x1764   :  { %v1283_v12 = vsub.f32 0.0, %v1282_v51 }
0x1766   :  { %v1284_v15 = vmul.f32 1.442695, %v1283_v12 }
0x1768   :  { %1722 = vpow2.f32 %v1284_v15 }
0x1772   :  { %v1723_v16 = vpop.eup %1722 }
0x1773   :  { %v1286_v21 = vadd.f32 1.0, %v1723_v16  ;;  %v1289_v22 = vmul.f32 -0.5, %v1723_v16  ;;  %v1292_v28 = vand.u32 2147483647, %v1723_v16 }
0x1775   :  { %1724 = vlog2.f32 %v1286_v21  ;;  %v1290_v27 = vadd.f32 1.0, %v1289_v22  ;;  %vm1293_vm7 = vcmp.lt.f32.partialorder %v1292_v28, 0.0004427343 }
0x1777   :  { %v1291_v37 = vmul.f32 %v1723_v16, %v1290_v27 }
0x177f   :  { %v1725_v33 = vpop.eup %1724 }
0x1780   :  { %v1288_v34 = vmul.f32 0.6931472, %v1725_v33 }
0x1782   :  { %v1294_v38 = vsel %vm1293_vm7, %v1291_v37, %v1288_v34 }
0x1783   :  { %v1295_v10 = vadd.f32 %v1294_v38, %v1279_v2 }
0x1785   :  { %v1296_v52 = vsel %vm1280_vm8, %v1261_v3, %v1295_v10 }
0x1786   :  { %1299 = vrot.lane.b32.xlu0 %v1296_v52, %s1736_s4 }
0x178a   :  { %1308 = vrot.lane.b32.xlu0 %v1296_v52, %s1737_s29 }
0x17f0   :  { %v1267_v53 = vpop.xlane.xlu0 %1266 }
0x17f1   :  { %v1269_v54 = vmul.f32 0.125, %v1267_v53 }
0x17f3   :  { %v1270_v55 = vsub.f32 %v1261_v3, %v1269_v54 }
0x17f5   :  { %v1271_v56 = vmul.f32 %v1270_v55, %v1270_v55 }
0x17f7   :  { %v1272_v57 = vsel %vm1264_vm6, %v1271_v56, 0.0 }
0x17f8   :  { %1273 = vadd.xlane.f32.xlu1 %v1272_v57  ;;  %v1300_v49 = vpop.permute.xlu0 %1299 }
0x17f9   :  { %v1302_v63 = vmul.f32 %v1300_v49, %v1297_v48 }
0x17fc   :  { %v1309_v5 = vpop.permute.xlu0 %1308 }
0x1885   :  { %v1274_v59 = vpop.xlane.xlu1 %1273 }
0x1886   :  { %v1275_v60 = vmul.f32 0.125, %v1274_v59 }
0x1888   :  { %v1276_v61 = vadd.f32 1e-05, %v1275_v60 }
0x188a   :  { %1726 = vrsqrt.f32 %v1276_v61 }
0x1894   :  { %v1727_v58 = vpop.eup %1726 }
0x1895   :  { %v1278_v62 = vmul.f32 %v1727_v58, %v1270_v55 }
0x1897   :  { %1305 = vrot.lane.b32.xlu1 %v1278_v62, %s1737_s29  ;;  %v1303_v0 = vadd.f32 %v1302_v63, %v1278_v62 }
0x1909   :  { %v1306_v1 = vpop.permute.xlu1 %1305 }
0x190a   :  { %v1312_v6 = vsel %vm1311_vm9, %v1303_v0, %v1306_v1 }
0x190b   :  { %v1313_v7 = vsel %vm55_vm0, %v1312_v6, %v1309_v5 }
0x190c   :  { %1315 = vst.msk [vmem:[%s2235_s6] sm:$0x3] %vm1314_vm10, %v1313_v7 }

</bundles_post_ra>
